<compile_context>
chip_gen: v6e
topology: v6e:2x2x1
jax: 0.10.0
libtpu: 0.0.40
codegen_flags: <defaults>
</compile_context>

<pallas_src>
import functools

import jax
import jax.numpy as jnp
from jax.experimental import pallas as pl
from jax.experimental.pallas import tpu as pltpu


def _multi_head_kernel(q_ref, k_ref, v_ref,
                       wq_ref, bq_ref, wk_ref, bk_ref, wv_ref, bv_ref,
                       wo_ref, bo_ref, gamma_ref, beta_ref,
                       out_ref, att_ref, *, h, eps):
    S, d_m = q_ref.shape[1], q_ref.shape[2]
    d_v = d_m // h

    # Residual input kept in f32; bf16 copies for the MXU, cast ONCE per step.
    q_in = q_ref[0]                                    # (S, d_m) f32
    qb = q_in.astype(jnp.bfloat16)
    kb = k_ref[0].astype(jnp.bfloat16)
    vb = v_ref[0].astype(jnp.bfloat16)

    # Full-width projections: canonical (S, d_m) x (d_m, d_m) MXU matmuls.
    # wq/bq already carry the 1/sqrt(d_v) attention scale (folded in wrapper).
    Q = (jnp.dot(qb, wq_ref[...], preferred_element_type=jnp.float32)
         + bq_ref[...]).astype(jnp.bfloat16)           # (S, d_m)
    K = (jnp.dot(kb, wk_ref[...], preferred_element_type=jnp.float32)
         + bk_ref[...]).astype(jnp.bfloat16)           # (S, d_m)
    V = (jnp.dot(vb, wv_ref[...], preferred_element_type=jnp.float32)
         + bv_ref[...]).astype(jnp.bfloat16)           # (S, d_m)

    # Contract the last dim of both operands: Q_h @ K_h^T without a transpose.
    dn_qk = (((1,), (1,)), ((), ()))

    ctx_parts = []
    for hi in range(h):                                # static unroll (h is small)
        sl = slice(hi * d_v, (hi + 1) * d_v)
        s = jax.lax.dot_general(Q[:, sl], K[:, sl], dn_qk,
                                preferred_element_type=jnp.float32)   # (S, S)
        # Softmax over keys (no mask in this forward path).  Exact denominator:
        # att is a returned output, so its rows must sum to 1.
        m = jnp.max(s, axis=-1, keepdims=True)
        e = jnp.exp(s - m)
        att = e / jnp.sum(e, axis=-1, keepdims=True)
        # TODO(synk): attention dropout omitted (eval-mode / deterministic kernel).
        att_ref[hi] = att.astype(att_ref.dtype)
        ctx_parts.append(jnp.dot(att.astype(jnp.bfloat16), V[:, sl],
                                 preferred_element_type=jnp.float32))  # (S, d_v)

    # ONE full-width output projection over the concatenated heads.
    ctx = jnp.concatenate(ctx_parts, axis=-1).astype(jnp.bfloat16)      # (S, d_m)
    proj = jnp.dot(ctx, wo_ref[...], preferred_element_type=jnp.float32) + bo_ref[...]
    # TODO(synk): output dropout omitted (eval-mode / deterministic kernel).

    # Residual + LayerNorm over the feature axis, written straight to the output.
    x = q_in + proj
    mean = jnp.mean(x, axis=-1, keepdims=True)
    var = jnp.mean((x - mean) ** 2, axis=-1, keepdims=True)
    y = (x - mean) * jax.lax.rsqrt(var + eps)
    out_ref[0] = y * gamma_ref[...] + beta_ref[...]


def multi_head_forward(q, k, v, params, *, h, eps=1e-5, att_dtype=jnp.float32):
    """q, k, v: (B, S, d_model) float32.  Returns (out (B,S,d_m), att (B*h,S,S))."""
    B, S, d_m = q.shape
    d_v = d_m // h

    wq, bq = params["q_w"]
    wk, bk = params["k_w"]
    wv, bv = params["v_w"]
    wo, bo = params["multi_head"]
    gamma, beta = params["layer_norm"]

    scale = jnp.float32(d_v) ** 0.5

    # Pre-transposed (in, out) weight layouts -> canonical (M,K)x(K,N) in-kernel.
    # Wq / bq carry the 1/sqrt(d_v) attention scale; matmul operands are bf16.
    wq_t = (wq / scale).T.astype(jnp.bfloat16)          # (d_m, d_m)
    wk_t = wk.T.astype(jnp.bfloat16)                    # (d_m, d_m)
    wv_t = wv.T.astype(jnp.bfloat16)                    # (d_m, d_m)
    wo_t = wo.T.astype(jnp.bfloat16)                    # (h*d_v, d_m) = (d_m, d_m)
    bq2 = (bq / scale).reshape(1, d_m).astype(jnp.float32)
    bk2 = bk.reshape(1, d_m).astype(jnp.float32)
    bv2 = bv.reshape(1, d_m).astype(jnp.float32)
    bo2 = bo.reshape(1, d_m).astype(jnp.float32)
    gamma2 = gamma.reshape(1, d_m).astype(jnp.float32)
    beta2 = beta.reshape(1, d_m).astype(jnp.float32)

    act_spec = pl.BlockSpec((1, S, d_m), lambda b: (b, 0, 0))
    # Constant block index => weights/biases are fetched once and stay resident.
    w_spec = pl.BlockSpec((d_m, d_m), lambda b: (0, 0))
    vec_spec = pl.BlockSpec((1, d_m), lambda b: (0, 0))

    kernel = functools.partial(_multi_head_kernel, h=h, eps=eps)

    out, att4 = pl.pallas_call(
        kernel,
        out_shape=(
            jax.ShapeDtypeStruct((B, S, d_m), jnp.float32),
            jax.ShapeDtypeStruct((B, h, S, S), att_dtype),
        ),
        grid_spec=pltpu.PrefetchScalarGridSpec(
            num_scalar_prefetch=0,
            grid=(B,),
            in_specs=[
                act_spec, act_spec, act_spec,      # q, k, v
                w_spec, vec_spec,                  # q_w (scaled, pre-transposed)
                w_spec, vec_spec,                  # k_w
                w_spec, vec_spec,                  # v_w
                w_spec, vec_spec,                  # multi_head (output projection)
                vec_spec, vec_spec,                # layer_norm gamma, beta
            ],
            out_specs=[
                pl.BlockSpec((1, S, d_m), lambda b: (b, 0, 0)),
                pl.BlockSpec((None, h, S, S), lambda b: (b, 0, 0, 0)),
            ],
        ),
        compiler_params=pltpu.CompilerParams(
            dimension_semantics=("parallel",),
            # Raised scoped-VMEM ceiling so larger (S, d_m) blocks fit without
            # shrinking; toy shapes use a tiny fraction of this.
            vmem_limit_bytes=64 * 1024 * 1024),
    )(q, k, v, wq_t, bq2, wk_t, bk2, wv_t, bv2, wo_t, bo2, gamma2, beta2)

    return out, att4.reshape(B * h, S, S)


def reference_forward(q, k, v, params, *, h, eps=1e-5):
    """Pure-JAX f32 reference (mirrors the PyTorch forward in eval mode)."""
    B, S, d_m = q.shape
    d_v = d_m // h
    wq, bq = params["q_w"]
    wk, bk = params["k_w"]
    wv, bv = params["v_w"]
    wo, bo = params["multi_head"]
    gamma, beta = params["layer_norm"]

    def lin(x, w, b):
        return jnp.einsum("bsd,od->bso", x, w) + b

    def split(x):
        return x.reshape(B, S, h, d_v).transpose(0, 2, 1, 3).reshape(B * h, S, d_v)

    Q, K, V = split(lin(q, wq, bq)), split(lin(k, wk, bk)), split(lin(v, wv, bv))
    scores = jnp.einsum("bqd,bkd->bqk", Q / (d_v ** 0.5), K)
    att = jax.nn.softmax(scores, axis=-1)
    ctx = jnp.einsum("bqk,bkd->bqd", att, V)
    ctx = ctx.reshape(B, h, S, d_v).transpose(0, 2, 1, 3).reshape(B, S, d_m)
    out = jnp.einsum("bsd,od->bso", ctx, wo) + bo
    x = q + out
    mean = jnp.mean(x, axis=-1, keepdims=True)
    var = jnp.mean((x - mean) ** 2, axis=-1, keepdims=True)
    y = (x - mean) * jax.lax.rsqrt(var + eps)
    return y * gamma + beta, att


def init_params(key, d_model):
    """Deterministic PyTorch-style init: U(-1/sqrt(fan_in), 1/sqrt(fan_in))."""
    bound = 1.0 / (d_model ** 0.5)
    keys = jax.random.split(key, 8)
    params = {}
    for name, (kw, kb) in zip(("q_w", "k_w", "v_w", "multi_head"),
                              zip(keys[0::2], keys[1::2])):
        w = jax.random.uniform(kw, (d_model, d_model), jnp.float32, -bound, bound)
        b = jax.random.uniform(kb, (d_model,), jnp.float32, -bound, bound)
        params[name] = (w, b)
    params["layer_norm"] = (jnp.ones((d_model,), jnp.float32),
                            jnp.zeros((d_model,), jnp.float32))
    return params


if __name__ == "__main__":
    B, S, d_model, h = 2, 8, 32, 4

    key = jax.random.PRNGKey(0)
    kq, kk, kv, kp = jax.random.split(key, 4)
    q = jax.random.normal(kq, (B, S, d_model), jnp.float32)
    k = jax.random.normal(kk, (B, S, d_model), jnp.float32)
    v = jax.random.normal(kv, (B, S, d_model), jnp.float32)
    params = init_params(kp, d_model)

    out, att = multi_head_forward(q, k, v, params, h=h)
    jax.block_until_ready((out, att))

    out_ref, att_ref = reference_forward(q, k, v, params, h=h)
    assert out.shape == (B, S, d_model)
    assert att.shape == (B * h, S, S)
    # bf16 MXU matmuls (f32 accumulation) -> looser tolerance vs the f32 reference.
    assert jnp.allclose(att, att_ref, atol=2e-2, rtol=2e-2), "attention mismatch"
    assert jnp.allclose(out, out_ref, atol=3e-2, rtol=3e-2), "output mismatch"

    print("KERNEL_OK")
</pallas_src>

<mosaic_0001>
module attributes {stable_mosaic.version = 11 : i64} {
  func.func @_multi_head_kernel(%arg0: i32, %arg1: memref<1x8x32xf32, #tpu.memory_space<vmem>>, %arg2: memref<1x8x32xf32, #tpu.memory_space<vmem>>, %arg3: memref<1x8x32xf32, #tpu.memory_space<vmem>>, %arg4: memref<32x32xbf16, #tpu.memory_space<vmem>>, %arg5: memref<1x32xf32, #tpu.memory_space<vmem>>, %arg6: memref<32x32xbf16, #tpu.memory_space<vmem>>, %arg7: memref<1x32xf32, #tpu.memory_space<vmem>>, %arg8: memref<32x32xbf16, #tpu.memory_space<vmem>>, %arg9: memref<1x32xf32, #tpu.memory_space<vmem>>, %arg10: memref<32x32xbf16, #tpu.memory_space<vmem>>, %arg11: memref<1x32xf32, #tpu.memory_space<vmem>>, %arg12: memref<1x32xf32, #tpu.memory_space<vmem>>, %arg13: memref<1x32xf32, #tpu.memory_space<vmem>>, %arg14: memref<1x8x32xf32, #tpu.memory_space<vmem>>, %arg15: memref<1x4x8x8xf32, #tpu.memory_space<vmem>>) attributes {dimension_semantics = [#tpu.dimension_semantics<parallel>], iteration_bounds = array<i64: 2>, scalar_prefetch = 0 : i64, scratch_operands = 0 : i64, tpu.core_type = #tpu.core_type<tc>, window_params = [{transform_indices = @transform_0, window_bounds = array<i64: 1, 8, 32>}, {transform_indices = @transform_1, window_bounds = array<i64: 1, 8, 32>}, {transform_indices = @transform_2, window_bounds = array<i64: 1, 8, 32>}, {pipeline_mode = #tpu.pipeline_mode<synchronous>, transform_indices = @transform_3, window_bounds = array<i64: 32, 32>}, {pipeline_mode = #tpu.pipeline_mode<synchronous>, transform_indices = @transform_4, window_bounds = array<i64: 1, 32>}, {pipeline_mode = #tpu.pipeline_mode<synchronous>, transform_indices = @transform_5, window_bounds = array<i64: 32, 32>}, {pipeline_mode = #tpu.pipeline_mode<synchronous>, transform_indices = @transform_6, window_bounds = array<i64: 1, 32>}, {pipeline_mode = #tpu.pipeline_mode<synchronous>, transform_indices = @transform_7, window_bounds = array<i64: 32, 32>}, {pipeline_mode = #tpu.pipeline_mode<synchronous>, transform_indices = @transform_8, window_bounds = array<i64: 1, 32>}, {pipeline_mode = #tpu.pipeline_mode<synchronous>, transform_indices = @transform_9, window_bounds = array<i64: 32, 32>}, {pipeline_mode = #tpu.pipeline_mode<synchronous>, transform_indices = @transform_10, window_bounds = array<i64: 1, 32>}, {pipeline_mode = #tpu.pipeline_mode<synchronous>, transform_indices = @transform_11, window_bounds = array<i64: 1, 32>}, {pipeline_mode = #tpu.pipeline_mode<synchronous>, transform_indices = @transform_12, window_bounds = array<i64: 1, 32>}, {transform_indices = @transform_13, window_bounds = array<i64: 1, 8, 32>}, {transform_indices = @transform_14, window_bounds = array<i64: 1, 4, 8, 8>}]} {
    %c0 = arith.constant 0 : index
    %c0_0 = arith.constant 0 : index
    %c0_1 = arith.constant 0 : index
    %0 = vector.load %arg1[%c0, %c0_0, %c0_1] : memref<1x8x32xf32, #tpu.memory_space<vmem>>, vector<1x8x32xf32>
    %1 = vector.shape_cast %0 : vector<1x8x32xf32> to vector<8x32xf32>
    %2 = arith.truncf %1 : vector<8x32xf32> to vector<8x32xbf16>
    %c0_2 = arith.constant 0 : index
    %c0_3 = arith.constant 0 : index
    %c0_4 = arith.constant 0 : index
    %3 = vector.load %arg2[%c0_2, %c0_3, %c0_4] : memref<1x8x32xf32, #tpu.memory_space<vmem>>, vector<1x8x32xf32>
    %4 = vector.shape_cast %3 : vector<1x8x32xf32> to vector<8x32xf32>
    %5 = arith.truncf %4 : vector<8x32xf32> to vector<8x32xbf16>
    %c0_5 = arith.constant 0 : index
    %c0_6 = arith.constant 0 : index
    %c0_7 = arith.constant 0 : index
    %6 = vector.load %arg3[%c0_5, %c0_6, %c0_7] : memref<1x8x32xf32, #tpu.memory_space<vmem>>, vector<1x8x32xf32>
    %7 = vector.shape_cast %6 : vector<1x8x32xf32> to vector<8x32xf32>
    %8 = arith.truncf %7 : vector<8x32xf32> to vector<8x32xbf16>
    %c0_8 = arith.constant 0 : index
    %c0_9 = arith.constant 0 : index
    %9 = vector.load %arg4[%c0_8, %c0_9] : memref<32x32xbf16, #tpu.memory_space<vmem>>, vector<32x32xbf16>
    %cst = arith.constant dense<0.000000e+00> : vector<8x32xf32>
    %10 = tpu.matmul %2, %9, %cst {dimension_numbers = #tpu.dot_dimension_numbers<[1], [0], [0], [1], [0, 0, 1, 1], [], []>} : vector<8x32xbf16>, vector<32x32xbf16>, vector<8x32xf32> -> vector<8x32xf32>
    %c0_10 = arith.constant 0 : index
    %c0_11 = arith.constant 0 : index
    %11 = vector.load %arg5[%c0_10, %c0_11] : memref<1x32xf32, #tpu.memory_space<vmem>>, vector<1x32xf32>
    %12 = vector.broadcast %11 : vector<1x32xf32> to vector<8x32xf32>
    %13 = arith.addf %10, %12 : vector<8x32xf32>
    %14 = arith.truncf %13 : vector<8x32xf32> to vector<8x32xbf16>
    %c0_12 = arith.constant 0 : index
    %c0_13 = arith.constant 0 : index
    %15 = vector.load %arg6[%c0_12, %c0_13] : memref<32x32xbf16, #tpu.memory_space<vmem>>, vector<32x32xbf16>
    %cst_14 = arith.constant dense<0.000000e+00> : vector<8x32xf32>
    %16 = tpu.matmul %5, %15, %cst_14 {dimension_numbers = #tpu.dot_dimension_numbers<[1], [0], [0], [1], [0, 0, 1, 1], [], []>} : vector<8x32xbf16>, vector<32x32xbf16>, vector<8x32xf32> -> vector<8x32xf32>
    %c0_15 = arith.constant 0 : index
    %c0_16 = arith.constant 0 : index
    %17 = vector.load %arg7[%c0_15, %c0_16] : memref<1x32xf32, #tpu.memory_space<vmem>>, vector<1x32xf32>
    %18 = vector.broadcast %17 : vector<1x32xf32> to vector<8x32xf32>
    %19 = arith.addf %16, %18 : vector<8x32xf32>
    %20 = arith.truncf %19 : vector<8x32xf32> to vector<8x32xbf16>
    %c0_17 = arith.constant 0 : index
    %c0_18 = arith.constant 0 : index
    %21 = vector.load %arg8[%c0_17, %c0_18] : memref<32x32xbf16, #tpu.memory_space<vmem>>, vector<32x32xbf16>
    %cst_19 = arith.constant dense<0.000000e+00> : vector<8x32xf32>
    %22 = tpu.matmul %8, %21, %cst_19 {dimension_numbers = #tpu.dot_dimension_numbers<[1], [0], [0], [1], [0, 0, 1, 1], [], []>} : vector<8x32xbf16>, vector<32x32xbf16>, vector<8x32xf32> -> vector<8x32xf32>
    %c0_20 = arith.constant 0 : index
    %c0_21 = arith.constant 0 : index
    %23 = vector.load %arg9[%c0_20, %c0_21] : memref<1x32xf32, #tpu.memory_space<vmem>>, vector<1x32xf32>
    %24 = vector.broadcast %23 : vector<1x32xf32> to vector<8x32xf32>
    %25 = arith.addf %22, %24 : vector<8x32xf32>
    %26 = arith.truncf %25 : vector<8x32xf32> to vector<8x32xbf16>
    %27 = vector.extract_strided_slice %14 {offsets = [0, 0], sizes = [8, 8], strides = [1, 1]} : vector<8x32xbf16> to vector<8x8xbf16>
    %28 = vector.extract_strided_slice %20 {offsets = [0, 0], sizes = [8, 8], strides = [1, 1]} : vector<8x32xbf16> to vector<8x8xbf16>
    %cst_22 = arith.constant dense<0.000000e+00> : vector<8x8xf32>
    %29 = tpu.matmul %27, %28, %cst_22 {dimension_numbers = #tpu.dot_dimension_numbers<[1], [1], [0], [0], [0, 0, 1, 0], [], []>} : vector<8x8xbf16>, vector<8x8xbf16>, vector<8x8xf32> -> vector<8x8xf32>
    %cst_23 = arith.constant dense<0xFF800000> : vector<8xf32>
    %30 = vector.multi_reduction <maximumf>, %29, %cst_23 [1] : vector<8x8xf32> to vector<8xf32>
    %31 = vector.shape_cast %30 : vector<8xf32> to vector<8x1xf32>
    %32 = vector.broadcast %31 : vector<8x1xf32> to vector<8x8xf32>
    %33 = arith.subf %29, %32 : vector<8x8xf32>
    %34 = math.exp %33 : vector<8x8xf32>
    %cst_24 = arith.constant dense<0.000000e+00> : vector<8xf32>
    %35 = vector.multi_reduction <add>, %34, %cst_24 [1] : vector<8x8xf32> to vector<8xf32>
    %36 = vector.shape_cast %35 : vector<8xf32> to vector<8x1xf32>
    %37 = vector.broadcast %36 : vector<8x1xf32> to vector<8x8xf32>
    %38 = arith.divf %34, %37 : vector<8x8xf32>
    %c0_25 = arith.constant 0 : index
    %c0_26 = arith.constant 0 : index
    %c0_27 = arith.constant 0 : index
    %c0_28 = arith.constant 0 : index
    %39 = vector.load %arg15[%c0_25, %c0_26, %c0_27, %c0_28] : memref<1x4x8x8xf32, #tpu.memory_space<vmem>>, vector<1x1x8x8xf32>
    %40 = vector.shape_cast %39 : vector<1x1x8x8xf32> to vector<8x8xf32>
    %41 = vector.shape_cast %38 : vector<8x8xf32> to vector<1x1x8x8xf32>
    tpu.vector_store %arg15[%c0_25, %c0_26, %c0_27, %c0_28], %41 {strides = array<i32>} : memref<1x4x8x8xf32, #tpu.memory_space<vmem>>, vector<1x1x8x8xf32>,
    %42 = arith.truncf %38 : vector<8x8xf32> to vector<8x8xbf16>
    %43 = vector.extract_strided_slice %26 {offsets = [0, 0], sizes = [8, 8], strides = [1, 1]} : vector<8x32xbf16> to vector<8x8xbf16>
    %cst_29 = arith.constant dense<0.000000e+00> : vector<8x8xf32>
    %44 = tpu.matmul %42, %43, %cst_29 {dimension_numbers = #tpu.dot_dimension_numbers<[1], [0], [0], [1], [0, 0, 1, 1], [], []>} : vector<8x8xbf16>, vector<8x8xbf16>, vector<8x8xf32> -> vector<8x8xf32>
    %45 = vector.extract_strided_slice %14 {offsets = [0, 8], sizes = [8, 8], strides = [1, 1]} : vector<8x32xbf16> to vector<8x8xbf16>
    %46 = vector.extract_strided_slice %20 {offsets = [0, 8], sizes = [8, 8], strides = [1, 1]} : vector<8x32xbf16> to vector<8x8xbf16>
    %cst_30 = arith.constant dense<0.000000e+00> : vector<8x8xf32>
    %47 = tpu.matmul %45, %46, %cst_30 {dimension_numbers = #tpu.dot_dimension_numbers<[1], [1], [0], [0], [0, 0, 1, 0], [], []>} : vector<8x8xbf16>, vector<8x8xbf16>, vector<8x8xf32> -> vector<8x8xf32>
    %cst_31 = arith.constant dense<0xFF800000> : vector<8xf32>
    %48 = vector.multi_reduction <maximumf>, %47, %cst_31 [1] : vector<8x8xf32> to vector<8xf32>
    %49 = vector.shape_cast %48 : vector<8xf32> to vector<8x1xf32>
    %50 = vector.broadcast %49 : vector<8x1xf32> to vector<8x8xf32>
    %51 = arith.subf %47, %50 : vector<8x8xf32>
    %52 = math.exp %51 : vector<8x8xf32>
    %cst_32 = arith.constant dense<0.000000e+00> : vector<8xf32>
    %53 = vector.multi_reduction <add>, %52, %cst_32 [1] : vector<8x8xf32> to vector<8xf32>
    %54 = vector.shape_cast %53 : vector<8xf32> to vector<8x1xf32>
    %55 = vector.broadcast %54 : vector<8x1xf32> to vector<8x8xf32>
    %56 = arith.divf %52, %55 : vector<8x8xf32>
    %c0_33 = arith.constant 0 : index
    %c1 = arith.constant 1 : index
    %c0_34 = arith.constant 0 : index
    %c0_35 = arith.constant 0 : index
    %57 = vector.load %arg15[%c0_33, %c1, %c0_34, %c0_35] : memref<1x4x8x8xf32, #tpu.memory_space<vmem>>, vector<1x1x8x8xf32>
    %58 = vector.shape_cast %57 : vector<1x1x8x8xf32> to vector<8x8xf32>
    %59 = vector.shape_cast %56 : vector<8x8xf32> to vector<1x1x8x8xf32>
    tpu.vector_store %arg15[%c0_33, %c1, %c0_34, %c0_35], %59 {strides = array<i32>} : memref<1x4x8x8xf32, #tpu.memory_space<vmem>>, vector<1x1x8x8xf32>,
    %60 = arith.truncf %56 : vector<8x8xf32> to vector<8x8xbf16>
    %61 = vector.extract_strided_slice %26 {offsets = [0, 8], sizes = [8, 8], strides = [1, 1]} : vector<8x32xbf16> to vector<8x8xbf16>
    %cst_36 = arith.constant dense<0.000000e+00> : vector<8x8xf32>
    %62 = tpu.matmul %60, %61, %cst_36 {dimension_numbers = #tpu.dot_dimension_numbers<[1], [0], [0], [1], [0, 0, 1, 1], [], []>} : vector<8x8xbf16>, vector<8x8xbf16>, vector<8x8xf32> -> vector<8x8xf32>
    %63 = vector.extract_strided_slice %14 {offsets = [0, 16], sizes = [8, 8], strides = [1, 1]} : vector<8x32xbf16> to vector<8x8xbf16>
    %64 = vector.extract_strided_slice %20 {offsets = [0, 16], sizes = [8, 8], strides = [1, 1]} : vector<8x32xbf16> to vector<8x8xbf16>
    %cst_37 = arith.constant dense<0.000000e+00> : vector<8x8xf32>
    %65 = tpu.matmul %63, %64, %cst_37 {dimension_numbers = #tpu.dot_dimension_numbers<[1], [1], [0], [0], [0, 0, 1, 0], [], []>} : vector<8x8xbf16>, vector<8x8xbf16>, vector<8x8xf32> -> vector<8x8xf32>
    %cst_38 = arith.constant dense<0xFF800000> : vector<8xf32>
    %66 = vector.multi_reduction <maximumf>, %65, %cst_38 [1] : vector<8x8xf32> to vector<8xf32>
    %67 = vector.shape_cast %66 : vector<8xf32> to vector<8x1xf32>
    %68 = vector.broadcast %67 : vector<8x1xf32> to vector<8x8xf32>
    %69 = arith.subf %65, %68 : vector<8x8xf32>
    %70 = math.exp %69 : vector<8x8xf32>
    %cst_39 = arith.constant dense<0.000000e+00> : vector<8xf32>
    %71 = vector.multi_reduction <add>, %70, %cst_39 [1] : vector<8x8xf32> to vector<8xf32>
    %72 = vector.shape_cast %71 : vector<8xf32> to vector<8x1xf32>
    %73 = vector.broadcast %72 : vector<8x1xf32> to vector<8x8xf32>
    %74 = arith.divf %70, %73 : vector<8x8xf32>
    %c0_40 = arith.constant 0 : index
    %c2 = arith.constant 2 : index
    %c0_41 = arith.constant 0 : index
    %c0_42 = arith.constant 0 : index
    %75 = vector.load %arg15[%c0_40, %c2, %c0_41, %c0_42] : memref<1x4x8x8xf32, #tpu.memory_space<vmem>>, vector<1x1x8x8xf32>
    %76 = vector.shape_cast %75 : vector<1x1x8x8xf32> to vector<8x8xf32>
    %77 = vector.shape_cast %74 : vector<8x8xf32> to vector<1x1x8x8xf32>
    tpu.vector_store %arg15[%c0_40, %c2, %c0_41, %c0_42], %77 {strides = array<i32>} : memref<1x4x8x8xf32, #tpu.memory_space<vmem>>, vector<1x1x8x8xf32>,
    %78 = arith.truncf %74 : vector<8x8xf32> to vector<8x8xbf16>
    %79 = vector.extract_strided_slice %26 {offsets = [0, 16], sizes = [8, 8], strides = [1, 1]} : vector<8x32xbf16> to vector<8x8xbf16>
    %cst_43 = arith.constant dense<0.000000e+00> : vector<8x8xf32>
    %80 = tpu.matmul %78, %79, %cst_43 {dimension_numbers = #tpu.dot_dimension_numbers<[1], [0], [0], [1], [0, 0, 1, 1], [], []>} : vector<8x8xbf16>, vector<8x8xbf16>, vector<8x8xf32> -> vector<8x8xf32>
    %81 = vector.extract_strided_slice %14 {offsets = [0, 24], sizes = [8, 8], strides = [1, 1]} : vector<8x32xbf16> to vector<8x8xbf16>
    %82 = vector.extract_strided_slice %20 {offsets = [0, 24], sizes = [8, 8], strides = [1, 1]} : vector<8x32xbf16> to vector<8x8xbf16>
    %cst_44 = arith.constant dense<0.000000e+00> : vector<8x8xf32>
    %83 = tpu.matmul %81, %82, %cst_44 {dimension_numbers = #tpu.dot_dimension_numbers<[1], [1], [0], [0], [0, 0, 1, 0], [], []>} : vector<8x8xbf16>, vector<8x8xbf16>, vector<8x8xf32> -> vector<8x8xf32>
    %cst_45 = arith.constant dense<0xFF800000> : vector<8xf32>
    %84 = vector.multi_reduction <maximumf>, %83, %cst_45 [1] : vector<8x8xf32> to vector<8xf32>
    %85 = vector.shape_cast %84 : vector<8xf32> to vector<8x1xf32>
    %86 = vector.broadcast %85 : vector<8x1xf32> to vector<8x8xf32>
    %87 = arith.subf %83, %86 : vector<8x8xf32>
    %88 = math.exp %87 : vector<8x8xf32>
    %cst_46 = arith.constant dense<0.000000e+00> : vector<8xf32>
    %89 = vector.multi_reduction <add>, %88, %cst_46 [1] : vector<8x8xf32> to vector<8xf32>
    %90 = vector.shape_cast %89 : vector<8xf32> to vector<8x1xf32>
    %91 = vector.broadcast %90 : vector<8x1xf32> to vector<8x8xf32>
    %92 = arith.divf %88, %91 : vector<8x8xf32>
    %c0_47 = arith.constant 0 : index
    %c3 = arith.constant 3 : index
    %c0_48 = arith.constant 0 : index
    %c0_49 = arith.constant 0 : index
    %93 = vector.load %arg15[%c0_47, %c3, %c0_48, %c0_49] : memref<1x4x8x8xf32, #tpu.memory_space<vmem>>, vector<1x1x8x8xf32>
    %94 = vector.shape_cast %93 : vector<1x1x8x8xf32> to vector<8x8xf32>
    %95 = vector.shape_cast %92 : vector<8x8xf32> to vector<1x1x8x8xf32>
    tpu.vector_store %arg15[%c0_47, %c3, %c0_48, %c0_49], %95 {strides = array<i32>} : memref<1x4x8x8xf32, #tpu.memory_space<vmem>>, vector<1x1x8x8xf32>,
    %96 = arith.truncf %92 : vector<8x8xf32> to vector<8x8xbf16>
    %97 = vector.extract_strided_slice %26 {offsets = [0, 24], sizes = [8, 8], strides = [1, 1]} : vector<8x32xbf16> to vector<8x8xbf16>
    %cst_50 = arith.constant dense<0.000000e+00> : vector<8x8xf32>
    %98 = tpu.matmul %96, %97, %cst_50 {dimension_numbers = #tpu.dot_dimension_numbers<[1], [0], [0], [1], [0, 0, 1, 1], [], []>} : vector<8x8xbf16>, vector<8x8xbf16>, vector<8x8xf32> -> vector<8x8xf32>
    %99 = tpu.concatenate %44, %62, %80, %98 in 1 : vector<8x8xf32>, vector<8x8xf32>, vector<8x8xf32>, vector<8x8xf32> -> vector<8x32xf32>
    %100 = arith.truncf %99 : vector<8x32xf32> to vector<8x32xbf16>
    %c0_51 = arith.constant 0 : index
    %c0_52 = arith.constant 0 : index
    %101 = vector.load %arg10[%c0_51, %c0_52] : memref<32x32xbf16, #tpu.memory_space<vmem>>, vector<32x32xbf16>
    %cst_53 = arith.constant dense<0.000000e+00> : vector<8x32xf32>
    %102 = tpu.matmul %100, %101, %cst_53 {dimension_numbers = #tpu.dot_dimension_numbers<[1], [0], [0], [1], [0, 0, 1, 1], [], []>} : vector<8x32xbf16>, vector<32x32xbf16>, vector<8x32xf32> -> vector<8x32xf32>
    %c0_54 = arith.constant 0 : index
    %c0_55 = arith.constant 0 : index
    %103 = vector.load %arg11[%c0_54, %c0_55] : memref<1x32xf32, #tpu.memory_space<vmem>>, vector<1x32xf32>
    %104 = vector.broadcast %103 : vector<1x32xf32> to vector<8x32xf32>
    %105 = arith.addf %102, %104 : vector<8x32xf32>
    %106 = arith.addf %1, %105 : vector<8x32xf32>
    %cst_56 = arith.constant dense<0.000000e+00> : vector<8xf32>
    %107 = vector.multi_reduction <add>, %106, %cst_56 [1] : vector<8x32xf32> to vector<8xf32>
    %108 = vector.shape_cast %107 : vector<8xf32> to vector<8x1xf32>
    %cst_57 = arith.constant 3.200000e+01 : f32
    %109 = vector.broadcast %cst_57 : f32 to vector<8x1xf32>
    %110 = arith.divf %108, %109 : vector<8x1xf32>
    %111 = vector.broadcast %110 : vector<8x1xf32> to vector<8x32xf32>
    %112 = arith.subf %106, %111 : vector<8x32xf32>
    %113 = arith.mulf %112, %112 : vector<8x32xf32>
    %cst_58 = arith.constant dense<0.000000e+00> : vector<8xf32>
    %114 = vector.multi_reduction <add>, %113, %cst_58 [1] : vector<8x32xf32> to vector<8xf32>
    %115 = vector.shape_cast %114 : vector<8xf32> to vector<8x1xf32>
    %cst_59 = arith.constant 3.200000e+01 : f32
    %116 = vector.broadcast %cst_59 : f32 to vector<8x1xf32>
    %117 = arith.divf %115, %116 : vector<8x1xf32>
    %118 = vector.broadcast %110 : vector<8x1xf32> to vector<8x32xf32>
    %119 = arith.subf %106, %118 : vector<8x32xf32>
    %cst_60 = arith.constant 9.99999974E-6 : f32
    %120 = vector.broadcast %cst_60 : f32 to vector<8x1xf32>
    %121 = arith.addf %117, %120 : vector<8x1xf32>
    %122 = math.rsqrt %121 : vector<8x1xf32>
    %123 = vector.broadcast %122 : vector<8x1xf32> to vector<8x32xf32>
    %124 = arith.mulf %119, %123 : vector<8x32xf32>
    %c0_61 = arith.constant 0 : index
    %c0_62 = arith.constant 0 : index
    %125 = vector.load %arg12[%c0_61, %c0_62] : memref<1x32xf32, #tpu.memory_space<vmem>>, vector<1x32xf32>
    %126 = vector.broadcast %125 : vector<1x32xf32> to vector<8x32xf32>
    %127 = arith.mulf %124, %126 : vector<8x32xf32>
    %c0_63 = arith.constant 0 : index
    %c0_64 = arith.constant 0 : index
    %128 = vector.load %arg13[%c0_63, %c0_64] : memref<1x32xf32, #tpu.memory_space<vmem>>, vector<1x32xf32>
    %129 = vector.broadcast %128 : vector<1x32xf32> to vector<8x32xf32>
    %130 = arith.addf %127, %129 : vector<8x32xf32>
    %c0_65 = arith.constant 0 : index
    %c0_66 = arith.constant 0 : index
    %c0_67 = arith.constant 0 : index
    %131 = vector.load %arg14[%c0_65, %c0_66, %c0_67] : memref<1x8x32xf32, #tpu.memory_space<vmem>>, vector<1x8x32xf32>
    %132 = vector.shape_cast %131 : vector<1x8x32xf32> to vector<8x32xf32>
    %133 = vector.shape_cast %130 : vector<8x32xf32> to vector<1x8x32xf32>
    tpu.vector_store %arg14[%c0_65, %c0_66, %c0_67], %133 {strides = array<i32>} : memref<1x8x32xf32, #tpu.memory_space<vmem>>, vector<1x8x32xf32>,
    return
  }
  func.func @transform_0(%arg0: i32) -> (i32, i32, i32) {
    %c0_i32 = arith.constant 0 : i32
    %c0_i32_0 = arith.constant 0 : i32
    %c0_i32_1 = arith.constant 0 : i32
    return %arg0, %c0_i32, %c0_i32_0 : i32, i32, i32
  }
  func.func @transform_1(%arg0: i32) -> (i32, i32, i32) {
    %c0_i32 = arith.constant 0 : i32
    %c0_i32_0 = arith.constant 0 : i32
    %c0_i32_1 = arith.constant 0 : i32
    return %arg0, %c0_i32, %c0_i32_0 : i32, i32, i32
  }
  func.func @transform_2(%arg0: i32) -> (i32, i32, i32) {
    %c0_i32 = arith.constant 0 : i32
    %c0_i32_0 = arith.constant 0 : i32
    %c0_i32_1 = arith.constant 0 : i32
    return %arg0, %c0_i32, %c0_i32_0 : i32, i32, i32
  }
  func.func @transform_3(%arg0: i32) -> (i32, i32) {
    %c0_i32 = arith.constant 0 : i32
    %c0_i32_0 = arith.constant 0 : i32
    %c0_i32_1 = arith.constant 0 : i32
    return %c0_i32, %c0_i32_0 : i32, i32
  }
  func.func @transform_4(%arg0: i32) -> (i32, i32) {
    %c0_i32 = arith.constant 0 : i32
    %c0_i32_0 = arith.constant 0 : i32
    %c0_i32_1 = arith.constant 0 : i32
    return %c0_i32, %c0_i32_0 : i32, i32
  }
  func.func @transform_5(%arg0: i32) -> (i32, i32) {
    %c0_i32 = arith.constant 0 : i32
    %c0_i32_0 = arith.constant 0 : i32
    %c0_i32_1 = arith.constant 0 : i32
    return %c0_i32, %c0_i32_0 : i32, i32
  }
  func.func @transform_6(%arg0: i32) -> (i32, i32) {
    %c0_i32 = arith.constant 0 : i32
    %c0_i32_0 = arith.constant 0 : i32
    %c0_i32_1 = arith.constant 0 : i32
    return %c0_i32, %c0_i32_0 : i32, i32
  }
  func.func @transform_7(%arg0: i32) -> (i32, i32) {
    %c0_i32 = arith.constant 0 : i32
    %c0_i32_0 = arith.constant 0 : i32
    %c0_i32_1 = arith.constant 0 : i32
    return %c0_i32, %c0_i32_0 : i32, i32
  }
  func.func @transform_8(%arg0: i32) -> (i32, i32) {
    %c0_i32 = arith.constant 0 : i32
    %c0_i32_0 = arith.constant 0 : i32
    %c0_i32_1 = arith.constant 0 : i32
    return %c0_i32, %c0_i32_0 : i32, i32
  }
  func.func @transform_9(%arg0: i32) -> (i32, i32) {
    %c0_i32 = arith.constant 0 : i32
    %c0_i32_0 = arith.constant 0 : i32
    %c0_i32_1 = arith.constant 0 : i32
    return %c0_i32, %c0_i32_0 : i32, i32
  }
  func.func @transform_10(%arg0: i32) -> (i32, i32) {
    %c0_i32 = arith.constant 0 : i32
    %c0_i32_0 = arith.constant 0 : i32
    %c0_i32_1 = arith.constant 0 : i32
    return %c0_i32, %c0_i32_0 : i32, i32
  }
  func.func @transform_11(%arg0: i32) -> (i32, i32) {
    %c0_i32 = arith.constant 0 : i32
    %c0_i32_0 = arith.constant 0 : i32
    %c0_i32_1 = arith.constant 0 : i32
    return %c0_i32, %c0_i32_0 : i32, i32
  }
  func.func @transform_12(%arg0: i32) -> (i32, i32) {
    %c0_i32 = arith.constant 0 : i32
    %c0_i32_0 = arith.constant 0 : i32
    %c0_i32_1 = arith.constant 0 : i32
    return %c0_i32, %c0_i32_0 : i32, i32
  }
  func.func @transform_13(%arg0: i32) -> (i32, i32, i32) {
    %c0_i32 = arith.constant 0 : i32
    %c0_i32_0 = arith.constant 0 : i32
    %c0_i32_1 = arith.constant 0 : i32
    return %arg0, %c0_i32, %c0_i32_0 : i32, i32, i32
  }
  func.func @transform_14(%arg0: i32) -> (i32, i32, i32, i32) {
    %c0_i32 = arith.constant 0 : i32
    %c0_i32_0 = arith.constant 0 : i32
    %c0_i32_1 = arith.constant 0 : i32
    %c0_i32_2 = arith.constant 0 : i32
    return %arg0, %c0_i32, %c0_i32_0, %c0_i32_1 : i32, i32, i32, i32
  }
}

</mosaic_0001>

<bundles_post_ra>
// kernel: tpu_custom_call.1
= control target key start
LH: loop header
LB: loop body
LE: loop exit
PB: predicated region body
PF: predicated region fallthrough
CT: control target
= control target key end

     0   :  { %s2873_s0 = inlined_call_operand.hbm [shape: f32[2,8,32], index: 0, kind: input, shape index: {}]   ;;  %s2874_s1 = inlined_call_operand.hbm [shape: f32[2,8,32], index: 1, kind: input, shape index: {}]   ;;  %s2875_s2 = inlined_call_operand.hbm [shape: f32[2,8,32], index: 2, kind: input, shape index: {}]   ;;  %s2876_s3 = inlined_call_operand.hbm [shape: bf16[32,32], index: 3, kind: input, shape index: {}]   ;;  %s2877_s4 = inlined_call_operand.hbm [shape: f32[1,32], index: 4, kind: input, shape index: {}]   ;;  %s2878_s5 = inlined_call_operand.hbm [shape: bf16[32,32], index: 5, kind: input, shape index: {}]   ;;  %s2879_s6 = inlined_call_operand.hbm [shape: f32[1,32], index: 6, kind: input, shape index: {}]   ;;  %s2880_s7 = inlined_call_operand.hbm [shape: bf16[32,32], index: 7, kind: input, shape index: {}]   ;;  %s2881_s8 = inlined_call_operand.hbm [shape: f32[1,32], index: 8, kind: input, shape index: {}]   ;;  %s2882_s9 = inlined_call_operand.vmem [shape: bf16[32,32], index: 9, kind: input, shape index: {}]   ;;  %s2883_s10 = inlined_call_operand.vmem [shape: f32[1,32], index: 10, kind: input, shape index: {}]   ;;  %s2884_s11 = inlined_call_operand.vmem [shape: f32[1,32], index: 11, kind: input, shape index: {}]   ;;  %s2885_s12 = inlined_call_operand.vmem [shape: f32[1,32], index: 12, kind: input, shape index: {}]   ;;  %s2886_s13 = inlined_call_operand.hbm [shape: f32[2,8,32], index: 13, kind: output, shape index: {0}]   ;;  %s2887_s14 = inlined_call_operand.hbm [shape: f32[2,4,8,8], index: 14, kind: output, shape index: {1}]  }
   0x1   :  { %2908 = sst [smem:[#allocation33_spill]] %s2876_s3 }
   0x2   :  { %2909 = sst [smem:[#allocation34_spill]] %s2878_s5 }
   0x3   :  { %2910 = sst [smem:[#allocation35_spill]] %s2880_s7 }
   0x4   :  { %2911 = sst [smem:[#allocation36_spill]] %s2883_s10 }
   0x5   :  { %2912 = sst [smem:[#allocation37_spill]] %s2884_s11 }
   0x6   :  { %2913 = sst [smem:[#allocation38_spill]] %s2885_s12 }
   0x7   :  { %2914 = sst [smem:[#allocation39_spill]] %s2886_s13 }
   0x8   :  { %2915 = sst [smem:[#allocation40_spill]] %s2887_s14 }
   0x9   :  { %20 = vsyncpa [#allocation3], 0 }
   0xa   :  { %22 = vsyncpa [#allocation3 + $0x1], 0 }
   0xb   :  { %23 = vsyncpa [#allocation6], 0 }
   0xc   :  { %25 = vsyncpa [#allocation6 + $0x1], 0 }
   0xd   :  { %26 = vsyncpa [#allocation9], 0 }
   0xe   :  { %27 = vsyncpa [#allocation12], 0 }
   0xf   :  { %28 = vsyncpa [#allocation15], 0 }
  0x10   :  { %29 = vsyncpa [#allocation4], 0 }
  0x11   :  { %31 = vsyncpa [#allocation4 + $0x1], 0 }
  0x12   :  { %32 = vsyncpa [#allocation19], 0 }
  0x13   :  { %34 = vsyncpa [#allocation19 + $0x1], 0  ;;  %s2434_s29 = smov 0   ;;  %s2436_s30 = smov 0  }
  0x14   :  { %s2438_s15 = smov 0   ;;  %s2440_s16 = smov 0  }
  0x15 LB: > { %2916 = sst [smem:[#allocation27_spill]] %s2323_s29  ;;  %s2337_s17 = smov [#allocation8]   ;;  %s2335_s16 = sphi %s2440_s16, %s2958_s16   ;;  %s2331_s15 = sphi %s2438_s15, %s2962_s15   ;;  %s2327_s30 = sphi %s2436_s30, %s2961_s30   ;;  %s2323_s29 = sphi %s2434_s29, %s2960_s29  }
  0x16   : > { %2917 = sst [smem:[#allocation28_spill]] %s2335_s16  ;;  %s397_s18 = sshll.u32 %s2337_s17, 4  ;;  %s398_s18 = int_to_ptr.vmem [resolvable:$true] %s397_s18 }
  0x17   : > { %s2455_s19 = sadd.s32 4294967295, %s2335_s16   ;;  %p1655_p0 = scmp.ge.s32.totalorder %s2335_s16, 1 }
  0x18   : > { %p2896_p1 = scmp.eq.s32.totalorder %s2455_s19, 0  ;;  %p385_p2 = scmp.lt.s32.totalorder %s2335_s16, 3 }
  0x19   : > { %s2338_s21 = smov [#allocation11]   ;;  %s2339_s24 = smov [#allocation14]  }
  0x1a   : > { %p2460_p3 = pnand %p1655_p0, %p385_p2  ;;  %s421_s22 = sshll.u32 %s2338_s21, 4  ;;  %s2473_s22 = int_to_ptr.vmem [resolvable:$true] %s421_s22 }
  0x1b   : > { %s445_s25 = sshll.u32 %s2339_s24, 4  ;;  %s1996_s27 = scalar_lea.vmem %s398_s18, 256  ;;  %s2475_s25 = int_to_ptr.vmem [resolvable:$true] %s445_s25 }
  0x1c   : > { %s2918_s20 = scalar_select %p2460_p3, 1, 0 }
  0x1d   : > { %p1860_p5 = pneg %p2460_p3  ;;  %p1997_p8 = scmp.ne.s32.totalorder %s398_s18, %s1996_s27 }
  0x1e   : > { %p2004_p11 = scmp.lt.s32.totalorder %s398_s18, %s398_s18  ;;  %p2005_p12 = scmp.lt.s32.totalorder %s1996_s27, %s1996_s27 }
  0x1f   : > { %p2469_p6 = pnand %p1860_p5, %p2896_p1 }
  0x20   : > { %p2006_p13 = por %p2005_p12, %p2004_p11 }
  0x21   : > { %s2919_s23 = scalar_select %p2469_p6, 1, 0 }
  0x22   : > { %p2479_p7 = pneg %p2469_p6 }
  0x24   : > { %s2920_s26 = scalar_select %p2479_p7, 1, 0 }
  0x25   : > { %p1999_p9 = pnand %p1997_p8, %p2479_p7 }
  0x27   : > { %p2000_p10 = pneg %p1999_p9 }
  0x29   : > { %p2007_p0 = pnand %p2006_p13, %p2000_p10 }
  0x2b   : > { %2010 = shalt.err (!%p2007_p0)
}
  0x2c   : > { %s2340_s28 = smov 64   ;;  %s2341_s17 = smov 4  }
  0x2d   : > { %s2921_s3 = sld [smem:[#allocation33_spill]]  ;;  %s2022_s13 = scalar_lea.vmem %s2473_s22, 256 }
  0x2e   : > { %p2023_p2 = scmp.ne.s32.totalorder %s2473_s22, %s2022_s13  ;;  %p2030_p9 = scmp.lt.s32.totalorder %s2473_s22, %s2473_s22 }
  0x2f   : > { %p2031_p10 = scmp.lt.s32.totalorder %s2022_s13, %s2022_s13 }
  0x30   : > { %p2025_p5 = pnand %p2023_p2, %p2479_p7 }
  0x31   : > { %p2032_p11 = por %p2031_p10, %p2030_p9 }
  0x32   : > { %p2026_p8 = pneg %p2025_p5 }
  0x33   : > { %1863 = dma.hbm_to_vmem [thread:$0]  (!%p2469_p6), %s2921_s3, 256, %s398_s18, [#allocation9], %s2340_s28, %s2340_s28, %s2341_s17  }
  0x34   : > { %p2033_p12 = pnand %p2032_p11, %p2026_p8 }
  0x36   : > { %2036 = shalt.err (!%p2033_p12)
}
  0x37   : > { %s2922_s5 = sld [smem:[#allocation34_spill]]  ;;  %s2048_s18 = scalar_lea.vmem %s2475_s25, 256 }
  0x38   : > { %p2049_p13 = scmp.ne.s32.totalorder %s2475_s25, %s2048_s18  ;;  %p2056_p5 = scmp.lt.s32.totalorder %s2475_s25, %s2475_s25 }
  0x39   : > { %p2057_p8 = scmp.lt.s32.totalorder %s2048_s18, %s2048_s18 }
  0x3a   : > { %p2051_p0 = pnand %p2049_p13, %p2479_p7 }
  0x3b   : > { %p2058_p9 = por %p2057_p8, %p2056_p5 }
  0x3c   : > { %p2052_p2 = pneg %p2051_p0 }
  0x3d   : > { %1869 = dma.hbm_to_vmem [thread:$0]  (!%p2469_p6), %s2922_s5, 256, %s2473_s22, [#allocation12], %s2340_s28, %s2340_s28, %s2341_s17  }
  0x3e   : > { %p2059_p10 = pnand %p2058_p9, %p2052_p2 }
  0x40   : > { %2062 = shalt.err (!%p2059_p10)
}
  0x41   : > { %s2923_s7 = sld [smem:[#allocation35_spill]]  ;;  %s1654_s22 = sadd.s32 4294967294, %s2335_s16  }
  0x42   : > { %s2516_s21 = sadd.s32 1, %s2335_s16   ;;  %s47_s24 = sadd.s32 1, %s2331_s15 }
  0x43   : > { %2924 = sst [smem:[#allocation29_spill]] %s2516_s21  ;;  %s44_s27 = ssub.s32 %s2335_s16, %s2516_s21 }
  0x44   : > { %p54_p11 = scmp.ne.s32.totalorder %s2331_s15, %s2327_s30  ;;  %p45_p12 = scmp.eq.s32.totalorder %s44_s27, 0 }
  0x45   : > { %p55_p13 = scmp.eq.s32.totalorder %s2335_s16, 0  ;;  %p60_p0 = scmp.ne.s32.totalorder %s2327_s30, %s2323_s29 }
  0x46   : > { %p346_p2 = scmp.eq.s32.totalorder %s2455_s19, 1  ;;  %p352_p10 = scmp.eq.s32.totalorder %s1654_s22, 1 }
  0x47   : > { %1875 = dma.hbm_to_vmem [thread:$0]  (!%p2469_p6), %s2923_s7, 256, %s2475_s25, [#allocation15], %s2340_s28, %s2340_s28, %s2341_s17  }
  0x48   : > { %s2528_s18 = scalar_select %p45_p12, %s2331_s15, %s47_s24  }
  0x49   : > { %p56_p5 = por %p55_p13, %p54_p11  ;;  %p2532_p8 = por %p2896_p1, %p60_p0 }
  0x4a   : > { %2925 = sst [smem:[#allocation30_spill]] %s2528_s18  ;;  %p2536_p9 = por %p346_p2, %p54_p11 }
  0x4b   : > { %s2926_s25 = scalar_select %p2532_p8, 1, 0 }
  0x4c   : > { %s2927_s28 = scalar_select %p2536_p9, 1, 0 }
  0x4d   : > { %p1902_p4 = scmp.lt.s32.totalorder %s2335_s16, 2  ;;  %s2890_s17 = sand.u32 1, %s2331_s15  }
  0x4e   : > { %2928 = sst [smem:[#allocation31_spill]] %s2927_s28  ;;  %p2542_p3 = por %p352_p10, %p60_p0 }
  0x4f   : > { %s2548_s13 = sshll.u32 %s2890_s17, 3  ;;  %s2551_s24 = sshll.u32 %s2335_s16, 7 }
  0x50   : > { %s2929_s12 = scalar_select %p2542_p3, 1, 0 }
  0x51   : > { %p2553_p12 = pnand %p1902_p4, %p56_p5  ;;  %s500_s3 = sand.u32 1, %s2335_s16  }
  0x52   : > { %2930 = sst [smem:[#allocation32_spill]] %s2929_s12  ;;  %s2562_s7 = scalar_lea.hbm %s2874_s1, %s2551_s24 }
  0x53   : > { %s2931_s27 = scalar_select %p2553_p12, 1, 0 }
  0x54   : > { %s504_s17 = scalar_lea.vmem [#allocation5], %s2548_s13  ;;  %s2565_s21 = scalar_lea.sflag [#allocation6], %s500_s3 }
  0x55   : > { %s511_s18 = sshll.u32 %s504_s17, 4  ;;  %s2063_s12 = scalar_lea.hbm %s2562_s7, 128  ;;  %s512_s18 = int_to_ptr.vmem [resolvable:$true] %s511_s18 }
  0x56   : > { %p2064_p4 = scmp.ne.s32.totalorder %s2562_s7, %s2063_s12  ;;  %p2571_p11 = pneg %p2553_p12 }
  0x57   : > { %s2068_s16 = scalar_lea.hbm %s2874_s1, 256  ;;  %p2069_p2 = scmp.lt.s32.totalorder %s2562_s7, %s2874_s1 }
  0x58   : > { %p2066_p13 = pnand %p2571_p11, %p2064_p4  ;;  %p2070_p5 = scmp.lt.s32.totalorder %s2068_s16, %s2063_s12 }
  0x5a   : > { %p2067_p0 = pneg %p2066_p13  ;;  %p2071_p10 = por %p2070_p5, %p2069_p2 }
  0x5c   : > { %p2072_p1 = pnand %p2071_p10, %p2067_p0 }
  0x5e   : > { %2075 = shalt.err (!%p2072_p1)
}
  0x5f   : > { %s2076_s3 = scalar_lea.vmem %s512_s18, 128  ;;  %s2342_s14 = smov [#allocation5]  }
  0x60   : > { %p2077_p3 = scmp.ne.s32.totalorder %s512_s18, %s2076_s3  ;;  %s2081_s28 = sshll.u32 %s2342_s14, 4  ;;  %s2082_s28 = int_to_ptr.vmem [resolvable:$false] %s2081_s28 }
  0x61   : > { %s2083_s10 = scalar_lea.vmem %s2082_s28, 256  ;;  %p2084_p4 = scmp.lt.s32.totalorder %s512_s18, %s2082_s28 }
  0x62   : > { %p2079_p9 = pnand %p2077_p3, %p2571_p11  ;;  %p2085_p13 = scmp.lt.s32.totalorder %s2083_s10, %s2076_s3 }
  0x64   : > { %p2080_p8 = pneg %p2079_p9  ;;  %p2086_p6 = por %p2085_p13, %p2084_p4 }
  0x66   : > { %p2087_p7 = pnand %p2086_p6, %p2080_p8 }
  0x68   : > { %2090 = shalt.err (!%p2087_p7)
}
  0x69   : > { %1885 = dma.hbm_to_vmem [thread:$0]  (!%p2553_p12), %s2562_s7, 128, %s512_s18, %s2565_s21  }
  0x6a   : > { %s2343_s11 = smov [#allocation10]   ;;  %s2344_s12 = smov [#allocation13]  }
  0x6b   : > { %s411_s16 = sshll.u32 %s2343_s11, 4  ;;  %s435_s5 = sshll.u32 %s2344_s12, 4  ;;  %s412_s16 = int_to_ptr.vmem [resolvable:$true] %s411_s16  ;;  %s436_s5 = int_to_ptr.vmem [resolvable:$true] %s435_s5 }
  0x6c   : > { %s2102_s22 = scalar_lea.vmem %s412_s16, 16  ;;  %p2933_p3 = scmp.ne.s32.totalorder %s2920_s26, 0 }
  0x6d   : > { %p2103_p1 = scmp.ne.s32.totalorder %s412_s16, %s2102_s22  ;;  %s2109_s10 = scalar_lea.vmem %s412_s16, 32 }
  0x6e   : > { %p2110_p2 = scmp.lt.s32.totalorder %s412_s16, %s412_s16  ;;  %p2111_p6 = scmp.lt.s32.totalorder %s2109_s10, %s2102_s22 }
  0x6f   : > { %p2105_p9 = pnand %p2103_p1, %p2933_p3 }
  0x70   : > { %p2112_p7 = por %p2111_p6, %p2110_p2 }
  0x71   : > { %p2106_p0 = pneg %p2105_p9 }
  0x73   : > { %p2113_p8 = pnand %p2112_p7, %p2106_p0 }
  0x75   : > { %2116 = shalt.err (!%p2113_p8)
}
  0x76   : > { %p2934_p5 = scmp.ne.s32.totalorder %s2919_s23, 0  ;;  %s2128_s18 = scalar_lea.vmem %s436_s5, 16 }
  0x77   : > { %p2129_p10 = scmp.ne.s32.totalorder %s436_s5, %s2128_s18  ;;  %s2135_s28 = scalar_lea.vmem %s436_s5, 32 }
  0x78   : > { %1866 = dma.hbm_to_vmem [thread:$0]  (!%p2934_p5), %s2877_s4, 16, %s412_s16, [#allocation9]  }
  0x79   : > { %p2131_p4 = pnand %p2129_p10, %p2933_p3  ;;  %p2136_p1 = scmp.lt.s32.totalorder %s436_s5, %s436_s5 }
  0x7a   : > { %p2137_p9 = scmp.lt.s32.totalorder %s2135_s28, %s2128_s18 }
  0x7b   : > { %p2132_p13 = pneg %p2131_p4 }
  0x7c   : > { %p2138_p12 = por %p2137_p9, %p2136_p1 }
  0x7e   : > { %p2139_p2 = pnand %p2138_p12, %p2132_p13 }
  0x80   : > { %2142 = shalt.err (!%p2139_p2)
}
  0x81   : > { %1872 = dma.hbm_to_vmem [thread:$0]  (!%p2934_p5), %s2879_s6, 16, %s436_s5, [#allocation12]  }
  0x82   : > { %s2345_s11 = smov [#allocation16]  }
  0x83   : > { %s459_s16 = sshll.u32 %s2345_s11, 4  ;;  %s460_s16 = int_to_ptr.vmem [resolvable:$true] %s459_s16 }
  0x84   : > { %s2154_s12 = scalar_lea.vmem %s460_s16, 16  ;;  %s2161_s22 = scalar_lea.vmem %s460_s16, 32 }
  0x85   : > { %p2155_p0 = scmp.ne.s32.totalorder %s460_s16, %s2154_s12  ;;  %p2162_p8 = scmp.lt.s32.totalorder %s460_s16, %s460_s16 }
  0x86   : > { %p2163_p10 = scmp.lt.s32.totalorder %s2161_s22, %s2154_s12 }
  0x87   : > { %p2157_p6 = pnand %p2155_p0, %p2933_p3 }
  0x88   : > { %p2164_p12 = por %p2163_p10, %p2162_p8 }
  0x89   : > { %p2158_p7 = pneg %p2157_p6 }
  0x8b   : > { %p2165_p4 = pnand %p2164_p12, %p2158_p7 }
  0x8d   : > { %2168 = shalt.err (!%p2165_p4)
}
  0x8e   : > { %1878 = dma.hbm_to_vmem [thread:$0]  (!%p2934_p5), %s2881_s8, 16, %s460_s16, [#allocation15]  }
  0x8f   : > { %s2615_s7 = scalar_lea.hbm %s2873_s0, %s2551_s24  ;;  %s486_s18 = scalar_lea.vmem [#allocation2], %s2548_s13 }
  0x90   : > { %s493_s28 = sshll.u32 %s486_s18, 4  ;;  %s2935_s23 = sand.u32 1, %s2331_s15   ;;  %s494_s28 = int_to_ptr.vmem [resolvable:$true] %s493_s28 }
  0x91   : > { %s483_s17 = scalar_lea.sflag [#allocation3], %s2935_s23  ;;  %s2169_s3 = scalar_lea.hbm %s2615_s7, 128 }
  0x92   : > { %p2170_p3 = scmp.ne.s32.totalorder %s2615_s7, %s2169_s3  ;;  %s2174_s12 = scalar_lea.hbm %s2873_s0, 256 }
  0x93   : > { %p2175_p5 = scmp.lt.s32.totalorder %s2615_s7, %s2873_s0  ;;  %p2176_p9 = scmp.lt.s32.totalorder %s2174_s12, %s2169_s3 }
  0x94   : > { %p2172_p13 = pnand %p2170_p3, %p2571_p11 }
  0x95   : > { %p2177_p2 = por %p2176_p9, %p2175_p5 }
  0x96   : > { %p2173_p1 = pneg %p2172_p13 }
  0x98   : > { %p2178_p0 = pnand %p2177_p2, %p2173_p1 }
  0x9a   : > { %2181 = shalt.err (!%p2178_p0)
}
  0x9b   : > { %s2182_s14 = scalar_lea.vmem %s494_s28, 128  ;;  %s2346_s5 = smov [#allocation2]  }
  0x9c   : > { %p2183_p6 = scmp.ne.s32.totalorder %s494_s28, %s2182_s14  ;;  %s2187_s26 = sshll.u32 %s2346_s5, 4  ;;  %s2188_s26 = int_to_ptr.vmem [resolvable:$false] %s2187_s26 }
  0x9d   : > { %s2189_s18 = scalar_lea.vmem %s2188_s26, 256  ;;  %p2190_p10 = scmp.lt.s32.totalorder %s494_s28, %s2188_s26 }
  0x9e   : > { %p2185_p7 = pnand %p2183_p6, %p2571_p11  ;;  %p2191_p12 = scmp.lt.s32.totalorder %s2189_s18, %s2182_s14 }
  0xa0   : > { %p2186_p8 = pneg %p2185_p7  ;;  %p2192_p4 = por %p2191_p12, %p2190_p10 }
  0xa2   : > { %p2193_p3 = pnand %p2192_p4, %p2186_p8 }
  0xa4   : > { %2196 = shalt.err (!%p2193_p3)
}
  0xa5   : > { %p2936_p13 = scmp.ne.s32.totalorder %s2931_s27, 0  ;;  %s527_s11 = scalar_lea.hbm %s2875_s2, %s2551_s24 }
  0xa6   : > { %s522_s16 = scalar_lea.vmem [#allocation7], %s2548_s13  ;;  %s2197_s22 = scalar_lea.hbm %s527_s11, 128 }
  0xa7   : > { %1882 = dma.hbm_to_vmem [thread:$0]  (!%p2936_p13), %s2615_s7, 128, %s494_s28, %s483_s17  }
  0xa8   : > { %s529_s12 = sshll.u32 %s522_s16, 4  ;;  %p2198_p1 = scmp.ne.s32.totalorder %s527_s11, %s2197_s22  ;;  %s530_s12 = int_to_ptr.vmem [resolvable:$true] %s529_s12 }
  0xa9   : > { %s2202_s5 = scalar_lea.hbm %s2875_s2, 256  ;;  %p2203_p2 = scmp.lt.s32.totalorder %s527_s11, %s2875_s2 }
  0xaa   : > { %p2200_p5 = pnand %p2198_p1, %p2571_p11  ;;  %p2204_p0 = scmp.lt.s32.totalorder %s2202_s5, %s2197_s22 }
  0xac   : > { %p2201_p9 = pneg %p2200_p5  ;;  %p2205_p6 = por %p2204_p0, %p2203_p2 }
  0xae   : > { %p2206_p7 = pnand %p2205_p6, %p2201_p9 }
  0xb0   : > { %2209 = shalt.err (!%p2206_p7)
}
  0xb1   : > { %s2210_s13 = scalar_lea.vmem %s530_s12, 128  ;;  %s2347_s24 = smov [#allocation7]  }
  0xb2   : > { %p2211_p8 = scmp.ne.s32.totalorder %s530_s12, %s2210_s13  ;;  %s2215_s7 = sshll.u32 %s2347_s24, 4  ;;  %s2216_s7 = int_to_ptr.vmem [resolvable:$false] %s2215_s7 }
  0xb3   : > { %s2217_s28 = scalar_lea.vmem %s2216_s7, 256  ;;  %p2218_p4 = scmp.lt.s32.totalorder %s530_s12, %s2216_s7 }
  0xb4   : > { %p2213_p10 = pnand %p2211_p8, %p2571_p11  ;;  %p2219_p3 = scmp.lt.s32.totalorder %s2217_s28, %s2210_s13 }
  0xb6   : > { %p2214_p12 = pneg %p2213_p10  ;;  %p2220_p1 = por %p2219_p3, %p2218_p4 }
  0xb8   : > { %p2221_p5 = pnand %p2220_p1, %p2214_p12 }
  0xba   : > { %2224 = shalt.err (!%p2221_p5)
}
  0xbb   : > { %1888 = dma.hbm_to_vmem [thread:$0]  (!%p2936_p13), %s527_s11, 128, %s530_s12, %s2565_s21  }
  0xbc   : > { %p2937_p9 = scmp.ne.s32.totalorder %s2918_s20, 0 }
  0xbd   : > { %s2657_s29 = sand.u32 (!%p2937_p9), 1, %s2327_s30   ;;  %p2938_p11 = scmp.ne.s32.totalorder (!%p2937_p9), %s2926_s25, 0 }
  0xbe   : > { %538 = sbr.rel (%p2937_p9) target bundleno = 1891 (0x763), region = 72  ;;  %s2660_s17 = sshll.u32 (!%p2937_p9), %s2657_s29, 3 }
  0xbf   : > { %s541_s23 = scalar_lea.sflag (!%p2937_p9), [#allocation3], %s2657_s29  ;;  %s544_s3 = scalar_lea.vmem (!%p2937_p9), [#allocation2], %s2660_s17 }
  0xc3   : > { %2294 = dma.done.wait (%p2938_p11), %s541_s23, 128  }
  0xc4   : > { %2296 = vsyncadd (%p2938_p11), %s541_s23, 4294967168  ;;  %s549_s20 = sand.u32 1, %s2455_s19   ;;  %s553_s27 = scalar_lea.vmem [#allocation5], %s2660_s17 }
  0xc5   : > { %s550_s21 = scalar_lea.sflag [#allocation6], %s549_s20 }
  0xc6   : > { %2298 = dma.done.wait (%p2938_p11), %s550_s21, 256  }
  0xc7   : > { %2300 = vsyncadd (%p2938_p11), %s550_s21, 4294967040  ;;  %s562_s11 = scalar_lea.vmem [#allocation7], %s2660_s17  ;;  %p2939_p13 = scmp.eq.s32.totalorder %s2455_s19, 0 }
  0xc9   : > { %2302 = dma.done.wait (%p2939_p13), [#allocation9], 272   ;;  %p2940_p2 = pmov %p2939_p13 }
  0xcb   : > { %2304 = vsyncadd (%p2940_p2), [#allocation9], 4294967024  ;;  %p2941_p0 = pmov %p2940_p2 }
  0xcd   : > { %2306 = dma.done.wait (%p2941_p0), [#allocation12], 272   ;;  %p2942_p6 = pmov %p2941_p0 }
  0xce   : > { %p2943_p7 = pmov %p2941_p0 }
  0xcf   : > { %2308 = vsyncadd (%p2942_p6), [#allocation12], 4294967024 }
  0xd0   : > { %2310 = dma.done.wait (%p2943_p7), [#allocation15], 272   ;;  %p2944_p8 = pmov %p2941_p0 }
  0xd1   : > { %v2348_v0 = vmov 0.0   ;;  %vm2349_vm0 = vmmov 0   ;;  %v1959_v1 = vld [vmem:[#allocation11 + $0x8] sm:$0xff]   ;;  %v1960_v2 = vld [vmem:[#allocation8 + $0x8] sm:$0xff]   ;;  %v1961_v3 = vld [vmem:[#allocation11] sm:$0xff]   ;;  %vm676_vm1 = vcmask 261120  }
  0xd2   : > { %2312 = vsyncadd (%p2944_p8), [#allocation15], 4294967024  ;;  %1754 = vmatprep.subr.bf16.mxu1 %v2348_v0  ;;  %1746 = vmatprep.subr.bf16.mxu0 %v2348_v0  ;;  %v1962_v4 = vld [vmem:[#allocation8] sm:$0xff]   ;;  %v2697_v6 = vld [vmem:[%s544_s3] sm:$0xff]  ;;  %vm855_vm2 = vcmask 64512   ;;  %s2350_s25 = smov 112  }
  0xd3   : > { %1758 = vmatprep.mubr.msk.bf16.mxu1 %vm2349_vm0, %v2348_v0  ;;  %1750 = vmatprep.mubr.msk.bf16.mxu0 %vm2349_vm0, %v2348_v0  ;;  %v649_v5 = vld [vmem:[%s553_s27] sm:$0xff]  ;;  %v648_v8 = vpack.c.bf16 %v2697_v6, %v2697_v6  ;;  %v1681_v10 = vld [vmem:[#allocation10] ss:$0 sm:$0xff]  ;;  %s2351_s16 = smov 120   ;;  %s2352_s12 = smov 104   ;;  %vm918_vm3 = vcmask 1043456  }
  0xd4   : > { %1755 = vmatpush3.bf16.msra.mxu1 %v1959_v1  ;;  %1747 = vmatpush3.bf16.msra.mxu0 %v1960_v2  ;;  %v650_v7 = vpack.c.bf16 %v649_v5, %v649_v5  ;;  %v1685_v9 = vld [vmem:[#allocation13] ss:$0 sm:$0xff]  ;;  %v1963_v24 = vld [vmem:[#allocation14 + $0x8] sm:$0xff]   ;;  %v1964_v25 = vld [vmem:[#allocation14] sm:$0xff]   ;;  %s1680_s22 = sshll.u32 %s2657_s29, 5  ;;  %s2353_s26 = smov 8  }
  0xd5   : > { %1756 = vmatprep.subr.bf16.mxu1 %v2348_v0  ;;  %1748 = vmatprep.subr.bf16.mxu0 %v2348_v0  ;;  %v651_v26 = vld [vmem:[%s562_s11] sm:$0xff]  ;;  %s2756_s10 = scalar_lea.vmem [#allocation18], %s1680_s22  ;;  %s2354_s24 = smov 16   ;;  %vm1314_vm4 = vcmask 130048   ;;  %vm1316_vm5 = vcmask 195584  }
  0xd6   : > { %v652_v27 = vpack.c.bf16 %v651_v26, %v651_v26  ;;  %v1689_v42 = vld [vmem:[#allocation16] ss:$0 sm:$0xff]  ;;  %s2355_s7 = smov 24   ;;  %s2945_s3 = sld [smem:[#allocation36_spill]] }
  0xd7   : > { %s2946_s20 = sld [smem:[#allocation31_spill]]  ;;  %s1717_s21 = sshll.u32 %s2455_s19, 9 }
  0xd8   : > { %1757 = vmatpush3.bf16.msra.mxu1 %v1961_v3  ;;  %1749 = vmatpush3.bf16.msra.mxu0 %v1962_v4  ;;  %s1449_s27 = sshll.u32 %s2756_s10, 4  ;;  %s1423_s14 = scalar_lea.sflag [#allocation19], %s2657_s29  ;;  %s2804_s27 = int_to_ptr.vmem [resolvable:$true] %s1449_s27 }
  0xd9   : > { %1770 = vmatprep.subr.bf16.mxu1 %v2348_v0  ;;  %1762 = vmatprep.subr.bf16.mxu0 %v2348_v0  ;;  %s2225_s5 = scalar_lea.vmem %s2804_s27, 512  ;;  %s2356_s18 = smov [#allocation18]  }
  0xda   : > { %p2226_p10 = scmp.ne.s32.totalorder %s2804_s27, %s2225_s5  ;;  %s2229_s13 = sshll.u32 %s2356_s18, 4  ;;  %s2230_s13 = int_to_ptr.vmem [resolvable:$false] %s2229_s13 }
  0xdb   : > { %1759 = vmatmul.mubr.msk.bf16.vlgmr.msra.gmra.mxu1 %vm676_vm1, %v650_v7  ;;  %1751 = vmatmul.mubr.msk.bf16.vlgmr.msra.gmra.mxu0 %vm676_vm1, %v648_v8  ;;  %p2232_p1 = scmp.lt.s32.totalorder %s2804_s27, %s2230_s13 }
  0xdc   : > { %1772 = vmatprep.mubr.msk.bf16.mxu1 %vm2349_vm0, %v2348_v0  ;;  %1766 = vmatprep.mubr.msk.bf16.mxu0 %vm2349_vm0, %v2348_v0 }
  0xdd   : > { %1763 = vmatpush3.bf16.msra.mxu0 %v1963_v24  ;;  %p2949_p12 = scmp.ne.s32.totalorder %s2946_s20, 0 }
  0xde   : > { %1764 = vmatprep.subr.bf16.mxu0 %v2348_v0 }
  0xdf   : > { %p2227_p4 = pnand %p2226_p10, %p2949_p12 }
  0xe1   : > { %1765 = vmatpush3.bf16.msra.mxu0 %v1964_v25  ;;  %p2228_p3 = pneg %p2227_p4 }
  0xe2   : > { %1776 = vmatprep.subr.bf16.mxu0 %v2348_v0 }
  0xe4   : > { %1767 = vmatmul.mubr.msk.bf16.vlgmr.msra.gmra.mxu0 %vm676_vm1, %v652_v27 }
  0xe5   : > { %1778 = vmatprep.mubr.msk.bf16.mxu0 %vm2349_vm0, %v2348_v0 }
 0x19b   : > { %v781_v11 = vpop.f32.mrf.mxu1  ;;  %v714_v13 = vpop.f32.mrf.mxu0 }
 0x19c   : > { %v782_v12 = vadd.f32 %v1685_v9, %v781_v11  ;;  %v715_v14 = vadd.f32 %v1681_v10, %v714_v13 }
 0x19d   : > { %v1760_v15 = vpop.f32.mrf.mxu1  ;;  %v1752_v17 = vpop.f32.mrf.mxu0 }
 0x19e   : > { %v787_v16 = vpack.c.bf16 %v782_v12, %v782_v12  ;;  %v720_v19 = vpack.c.bf16 %v715_v14, %v715_v14 }
 0x19f   : > { %v784_v18 = vpop.f32.mrf.mxu1  ;;  %v717_v20 = vpop.f32.mrf.mxu0 }
 0x1a0   : > { %1079 = vrot.lane.b32.xlu1 %v787_v16, %s2350_s25  ;;  %966 = vrot.lane.b32.xlu0 %v787_v16, %s2351_s16  ;;  %v860_v21 = vsel %vm855_vm2, %v787_v16, 0 }
 0x1a1   : > { %v1761_v22 = vpop.f32.mrf.mxu1  ;;  %1771 = vmatpush3.bf16.xpose.msra.mxu1 %v860_v21  ;;  %v1753_v23 = vpop.f32.mrf.mxu0 }
 0x1a2   : > { %1782 = vmatprep.subr.bf16.mxu1 %v2348_v0 }
 0x1a4   : > { %1077 = vrot.lane.b32.xlu1 %v720_v19, %s2350_s25  ;;  %963 = vrot.lane.b32.xlu0 %v720_v19, %s2351_s16  ;;  %v848_v43 = vpop.f32.mrf.mxu0 }
 0x1a5   : > { %v849_v44 = vadd.f32 %v1689_v42, %v848_v43 }
 0x1a6   : > { %v1768_v45 = vpop.f32.mrf.mxu0 }
 0x1a7   : > { %v854_v46 = vpack.c.bf16 %v849_v44, %v849_v44 }
 0x1a8   : > { %1189 = vrot.lane.b32.xlu1 %v720_v19, %s2352_s12  ;;  %1191 = vrot.lane.b32.xlu0 %v787_v16, %s2352_s12  ;;  %v851_v47 = vpop.f32.mrf.mxu0 }
 0x1a9   : > { %1773 = vmatmul.mubr.msk.bf16.vlgmr.msra.gmra.mxu1 %vm855_vm2, %v720_v19  ;;  %v920_v48 = vsel %vm918_vm3, %v854_v46, 0 }
 0x1aa   : > { %1784 = vmatprep.mubr.msk.bf16.mxu1 %vm2349_vm0, %v2348_v0  ;;  %v1769_v49 = vpop.f32.mrf.mxu0  ;;  %1777 = vmatpush3.bf16.msra.mxu0 %v920_v48 }
 0x1ab   : > { %1788 = vmatprep.subr.bf16.mxu0 %v2348_v0  ;;  %v1965_v49 = vld [vmem:[%s2882_s9 + $0x8] sm:$0xff]  }
 0x212   : > { %v967_v28 = vpop.permute.xlu0 %966  ;;  %v1080_v30 = vpop.permute.xlu1 %1079 }
 0x213   : > { %v972_v29 = vsel %vm855_vm2, %v967_v28, 0  ;;  %v1085_v32 = vsel %vm855_vm2, %v1080_v30, 0 }
 0x214   : > { %1783 = vmatpush3.bf16.xpose.msra.mxu1 %v972_v29 }
 0x215   : > { %1794 = vmatprep.subr.bf16.mxu1 %v2348_v0 }
 0x216   : > { %v964_v31 = vpop.permute.xlu0 %963  ;;  %v1078_v34 = vpop.permute.xlu1 %1077 }
 0x21a   : > { %v1192_v33 = vpop.permute.xlu0 %1191  ;;  %v1190_v36 = vpop.permute.xlu1 %1189 }
 0x21b   : > { %1785 = vmatmul.mubr.msk.bf16.vlgmr.msra.gmra.mxu1 %vm855_vm2, %v964_v31  ;;  %v1197_v35 = vsel %vm855_vm2, %v1192_v33, 0 }
 0x21c   : > { %1795 = vmatpush3.bf16.xpose.msra.mxu1 %v1085_v32  ;;  %1796 = vmatprep.mubr.msk.bf16.mxu1 %vm2349_vm0, %v2348_v0 }
 0x21d   : > { %1806 = vmatprep.subr.bf16.mxu1 %v2348_v0 }
 0x223   : > { %1797 = vmatmul.mubr.msk.bf16.vlgmr.msra.gmra.mxu1 %vm855_vm2, %v1078_v34 }
 0x224   : > { %1807 = vmatpush3.bf16.xpose.msra.mxu1 %v1197_v35  ;;  %1808 = vmatprep.mubr.msk.bf16.mxu1 %vm2349_vm0, %v2348_v0 }
 0x225   : > { %1818 = vmatprep.subr.bf16.mxu1 %v2348_v0 }
 0x22b   : > { %1809 = vmatmul.mubr.msk.bf16.vlgmr.msra.gmra.mxu1 %vm855_vm2, %v1190_v36 }
 0x22c   : > { %1822 = vmatprep.mubr.msk.bf16.mxu1 %vm2349_vm0, %v2348_v0  ;;  %1819 = vmatpush3.bf16.msra.mxu1 %v1965_v49 }
 0x22d   : > { %1820 = vmatprep.subr.bf16.mxu1 %v2348_v0 }
 0x269   : > { %v896_v37 = vpop.f32.mrf.mxu1 }
 0x26a   : > { %v902_v38 = vsel %vm855_vm2, %v896_v37, -inf }
 0x26b   : > { %903 = vmax.xlane.f32.xlu0 %v902_v38  ;;  %v1774_v39 = vpop.f32.mrf.mxu1 }
 0x26d   : > { %v899_v40 = vpop.f32.mrf.mxu1 }
 0x26f   : > { %v1775_v41 = vpop.f32.mrf.mxu1 }
 0x2db   : > { %v1008_v50 = vpop.f32.mrf.mxu1 }
 0x2dc   : > { %v1014_v51 = vsel %vm855_vm2, %v1008_v50, -inf }
 0x2dd   : > { %1015 = vmax.xlane.f32.xlu1 %v1014_v51  ;;  %v1786_v52 = vpop.f32.mrf.mxu1 }
 0x2de   : > { %v1966_v52 = vld [vmem:[%s2882_s9] sm:$0xff]  }
 0x2df   : > { %v1011_v53 = vpop.f32.mrf.mxu1  ;;  %1821 = vmatpush3.bf16.msra.mxu1 %v1966_v52 }
 0x2e1   : > { %v1787_v54 = vpop.f32.mrf.mxu1 }
 0x2e3   : > { %v1121_v55 = vpop.f32.mrf.mxu1 }
 0x2e4   : > { %v1127_v56 = vsel %vm855_vm2, %v1121_v55, -inf }
 0x2e5   : > { %1128 = vmax.xlane.f32.xlu0 %v1127_v56  ;;  %v1798_v57 = vpop.f32.mrf.mxu1 }
 0x2e7   : > { %v1124_v58 = vpop.f32.mrf.mxu1 }
 0x2e9   : > { %v1799_v59 = vpop.f32.mrf.mxu1 }
 0x2eb   : > { %v1233_v60 = vpop.f32.mrf.mxu1 }
 0x2ec   : > { %v1239_v61 = vsel %vm855_vm2, %v1233_v60, -inf }
 0x2ed   : > { %1240 = vmax.xlane.f32.xlu0 %v1239_v61  ;;  %v1810_v62 = vpop.f32.mrf.mxu1 }
 0x2ef   : > { %v1236_v63 = vpop.f32.mrf.mxu1 }
 0x2f1   : > { %v1811_v1 = vpop.f32.mrf.mxu1 }
 0x2f4   : > { %v904_v2 = vpop.xlane.xlu0 %903 }
 0x2f5   : > { %v905_v3 = vsub.f32 %v896_v37, %v904_v2 }
 0x2f7   : > { %v906_v4 = vmul.f32 1.442695, %v905_v3 }
 0x2f9   : > { %1967 = vpow2.f32 %v906_v4 }
 0x306   : > { %v1968_v5 = vpop.eup %1967 }
 0x307   : > { %v908_v7 = vsel %vm855_vm2, %v1968_v5, 0.0 }
 0x308   : > { %909 = vadd.xlane.f32.xlu1 %v908_v7  ;;  %v1704_v7 = vld [vmem:[%s2945_s3] ss:$0 sm:$0xff] }
 0x319   : > { %1029 = vrot.lane.b32.xlu1 %v854_v46, %s2351_s16  ;;  %s2947_s16 = sld [smem:[#allocation40_spill]] }
 0x31f   : > { %s2802_s22 = scalar_lea.hbm %s2947_s16, %s1717_s21 }
 0x366   : > { %v1016_v8 = vpop.xlane.xlu1 %1015 }
 0x367   : > { %v1017_v9 = vsub.f32 %v1008_v50, %v1016_v8 }
 0x369   : > { %v1018_v10 = vmul.f32 1.442695, %v1017_v9 }
 0x36b   : > { %1969 = vpow2.f32 %v1018_v10 }
 0x36e   : > { %v1129_v11 = vpop.xlane.xlu0 %1128 }
 0x36f   : > { %v1130_v12 = vsub.f32 %v1121_v55, %v1129_v11 }
 0x371   : > { %v1131_v13 = vmul.f32 1.442695, %v1130_v12 }
 0x373   : > { %1971 = vpow2.f32 %v1131_v13 }
 0x376   : > { %v1241_v14 = vpop.xlane.xlu0 %1240 }
 0x377   : > { %v1242_v15 = vsub.f32 %v1233_v60, %v1241_v14 }
 0x378   : > { %v1970_v16 = vpop.eup %1969 }
 0x379   : > { %v1243_v17 = vmul.f32 1.442695, %v1242_v15  ;;  %v1020_v18 = vsel %vm855_vm2, %v1970_v16, 0.0 }
 0x37a   : > { %1021 = vadd.xlane.f32.xlu0 %v1020_v18 }
 0x37b   : > { %1973 = vpow2.f32 %v1243_v17 }
 0x380   : > { %v1972_v19 = vpop.eup %1971 }
 0x381   : > { %v1133_v20 = vsel %vm855_vm2, %v1972_v19, 0.0 }
 0x382   : > { %1134 = vadd.xlane.f32.xlu1 %v1133_v20 }
 0x388   : > { %v1974_v21 = vpop.eup %1973 }
 0x389   : > { %v1245_v22 = vsel %vm855_vm2, %v1974_v21, 0.0 }
 0x38a   : > { %1246 = vadd.xlane.f32.xlu0 %v1245_v22 }
 0x391   : > { %v910_v23 = vpop.xlane.xlu1 %909 }
 0x392   : > { %1975 = vrcp.f32 %v910_v23 }
 0x393   : > { %1253 = vrot.lane.b32.xlu1 %v854_v46, %s2352_s12  ;;  %s2948_s12 = smov %s2947_s16 }
 0x395   : > { %v1030_v25 = vpop.permute.xlu1 %1029 }
 0x396   : > { %v1035_v28 = vsel %vm918_vm3, %v1030_v25, 0 }
 0x39f   : > { %v1976_v24 = vpop.eup %1975 }
 0x3a0   : > { %1141 = vrot.lane.b32.xlu0 %v854_v46, %s2350_s25  ;;  %v912_v26 = vmul.f32 %v1976_v24, %v1968_v5 }
 0x3a2   : > { %913 = vst.msk [vmem:[%s2756_s10] sm:$0xff] %vm855_vm2, %v912_v26  ;;  %v914_v27 = vpack.c.bf16 %v912_v26, %v912_v26 }
 0x3a4   : > { %1779 = vmatmul.mubr.msk.bf16.vlgmr.msra.gmra.mxu0 %vm855_vm2, %v914_v27 }
 0x3a5   : > { %1789 = vmatpush3.bf16.msra.mxu0 %v1035_v28  ;;  %1790 = vmatprep.mubr.msk.bf16.mxu0 %vm2349_vm0, %v2348_v0 }
 0x3a6   : > { %1800 = vmatprep.subr.bf16.mxu0 %v2348_v0 }
 0x403   : > { %v1022_v29 = vpop.xlane.xlu0 %1021 }
 0x404   : > { %1977 = vrcp.f32 %v1022_v29 }
 0x40b   : > { %v1135_v30 = vpop.xlane.xlu1 %1134 }
 0x40c   : > { %1979 = vrcp.f32 %v1135_v30 }
 0x40f   : > { %v1254_v39 = vpop.permute.xlu1 %1253 }
 0x410   : > { %v1259_v41 = vsel %vm918_vm3, %v1254_v39, 0 }
 0x411   : > { %v1978_v31 = vpop.eup %1977 }
 0x412   : > { %v1024_v32 = vmul.f32 %v1978_v31, %v1970_v16 }
 0x413   : > { %v1247_v33 = vpop.xlane.xlu0 %1246 }
 0x414   : > { %1981 = vrcp.f32 %v1247_v33  ;;  %1696 = vst.msk [vmem:[%s2756_s10 + $0x8] sm:$0xff] %vm855_vm2, %v1024_v32  ;;  %v1027_v34 = vpack.c.bf16 %v1024_v32, %v1024_v32 }
 0x416   : > { %1791 = vmatmul.mubr.msk.bf16.vlgmr.msra.gmra.mxu0 %vm855_vm2, %v1027_v34 }
 0x417   : > { %v1142_v35 = vpop.permute.xlu0 %1141  ;;  %1802 = vmatprep.mubr.msk.bf16.mxu0 %vm2349_vm0, %v2348_v0 }
 0x418   : > { %v1147_v36 = vsel %vm918_vm3, %v1142_v35, 0 }
 0x419   : > { %v1980_v37 = vpop.eup %1979  ;;  %1801 = vmatpush3.bf16.msra.mxu0 %v1147_v36 }
 0x41a   : > { %1812 = vmatprep.subr.bf16.mxu0 %v2348_v0  ;;  %v1137_v38 = vmul.f32 %v1980_v37, %v1972_v19 }
 0x41c   : > { %1699 = vst.msk [vmem:[%s2756_s10 + $0x10] sm:$0xff] %vm855_vm2, %v1137_v38  ;;  %v1140_v40 = vpack.c.bf16 %v1137_v38, %v1137_v38 }
 0x41e   : > { %1803 = vmatmul.mubr.msk.bf16.vlgmr.msra.gmra.mxu0 %vm855_vm2, %v1140_v40 }
 0x41f   : > { %1813 = vmatpush3.bf16.msra.mxu0 %v1259_v41  ;;  %1814 = vmatprep.mubr.msk.bf16.mxu0 %vm2349_vm0, %v2348_v0 }
 0x421   : > { %v1982_v42 = vpop.eup %1981 }
 0x422   : > { %v1249_v43 = vmul.f32 %v1982_v42, %v1974_v21 }
 0x424   : > { %1702 = vst.msk [vmem:[%s2756_s10 + $0x18] sm:$0xff] %vm855_vm2, %v1249_v43  ;;  %v1252_v44 = vpack.c.bf16 %v1249_v43, %v1249_v43  ;;  %s2231_s10 = scalar_lea.vmem %s2230_s13, 1024 }
 0x425   : > { %p2233_p5 = scmp.lt.s32.totalorder %s2231_s10, %s2225_s5 }
 0x426   : > { %1815 = vmatmul.mubr.msk.bf16.vlgmr.msra.gmra.mxu0 %vm855_vm2, %v1252_v44 }
 0x427   : > { %p2234_p9 = por %p2233_p5, %p2232_p1 }
 0x429   : > { %p2235_p11 = pnand %p2234_p9, %p2228_p3 }
 0x464   : > { %v956_v45 = vpop.f32.mrf.mxu0 }
 0x466   : > { %v1780_v46 = vpop.f32.mrf.mxu0 }
 0x468   : > { %v959_v47 = vpop.f32.mrf.mxu0 }
 0x46a   : > { %v1781_v48 = vpop.f32.mrf.mxu0 }
 0x4d6   : > { %v1071_v50 = vpop.f32.mrf.mxu0 }
 0x4d7   : > { %1302 = vrot.lane.b32.xlu1 %v1071_v50, %s2353_s26 }
 0x4d8   : > { %v1792_v51 = vpop.f32.mrf.mxu0 }
 0x4da   : > { %v1074_v53 = vpop.f32.mrf.mxu0 }
 0x4dc   : > { %v1793_v54 = vpop.f32.mrf.mxu0 }
 0x4de   : > { %v1183_v55 = vpop.f32.mrf.mxu0 }
 0x4df   : > { %1306 = vrot.lane.b32.xlu0 %v1183_v55, %s2354_s24 }
 0x4e0   : > { %v1804_v56 = vpop.f32.mrf.mxu0 }
 0x4e2   : > { %v1186_v57 = vpop.f32.mrf.mxu0 }
 0x4e4   : > { %v1805_v58 = vpop.f32.mrf.mxu0 }
 0x4e6   : > { %v1295_v59 = vpop.f32.mrf.mxu0 }
 0x4e7   : > { %1310 = vrot.lane.b32.xlu1 %v1295_v59, %s2355_s7 }
 0x4e8   : > { %v1816_v0 = vpop.f32.mrf.mxu0 }
 0x4ea   : > { %v1298_v60 = vpop.f32.mrf.mxu0 }
 0x4ec   : > { %v1817_v61 = vpop.f32.mrf.mxu0 }
 0x549   : > { %v1303_v62 = vpop.permute.xlu1 %1302 }
 0x54a   : > { %v1313_v1 = vsel %vm855_vm2, %v956_v45, %v1303_v62 }
 0x551   : > { %v1307_v63 = vpop.permute.xlu0 %1306 }
 0x552   : > { %v1315_v2 = vsel %vm1314_vm4, %v1313_v1, %v1307_v63 }
 0x559   : > { %v1311_v3 = vpop.permute.xlu1 %1310 }
 0x55a   : > { %v1317_v4 = vsel %vm1316_vm5, %v1315_v2, %v1311_v3 }
 0x55b   : > { %v1318_v5 = vpack.c.bf16 %v1317_v4, %v1317_v4 }
 0x55d   : > { %1823 = vmatmul.mubr.msk.bf16.vlgmr.msra.gmra.mxu1 %vm676_vm1, %v1318_v5 }
 0x61d   : > { %v1379_v8 = vpop.f32.mrf.mxu1 }
 0x61e   : > { %v1380_v9 = vadd.f32 %v1704_v7, %v1379_v8 }
 0x61f   : > { %v1824_v10 = vpop.f32.mrf.mxu1 }
 0x620   : > { %v1385_v11 = vadd.f32 %v1380_v9, %v2697_v6 }
 0x621   : > { %v1382_v12 = vpop.f32.mrf.mxu1 }
 0x622   : > { %v1386_v13 = vsel %vm676_vm1, %v1385_v11, 0.0 }
 0x623   : > { %1387 = vadd.xlane.f32.xlu0 %v1386_v13  ;;  %v1825_v14 = vpop.f32.mrf.mxu1 }
 0x6ac   : > { %v1388_v15 = vpop.xlane.xlu0 %1387 }
 0x6ad   : > { %v1390_v16 = vmul.f32 0.03125, %v1388_v15 }
 0x6af   : > { %v1391_v17 = vsub.f32 %v1385_v11, %v1390_v16 }
 0x6b1   : > { %v1392_v18 = vmul.f32 %v1391_v17, %v1391_v17 }
 0x6b3   : > { %v1393_v19 = vsel %vm676_vm1, %v1392_v18, 0.0 }
 0x6b4   : > { %1394 = vadd.xlane.f32.xlu1 %v1393_v19 }
 0x6b5   : > { %2238 = shalt.err (!%p2235_p11)
}
 0x6b6   : > { %s2239_s24 = scalar_lea.hbm %s2802_s22, 512  ;;  %s2243_s23 = scalar_lea.hbm %s2948_s12, 1024 }
 0x6b7   : > { %p2240_p13 = scmp.ne.s32.totalorder %s2802_s22, %s2239_s24  ;;  %p2244_p6 = scmp.lt.s32.totalorder %s2802_s22, %s2948_s12 }
 0x6b8   : > { %p2245_p7 = scmp.lt.s32.totalorder %s2243_s23, %s2239_s24 }
 0x6b9   : > { %p2241_p2 = pnand %p2240_p13, %p2949_p12 }
 0x6ba   : > { %p2246_p8 = por %p2245_p7, %p2244_p6 }
 0x6bb   : > { %p2242_p0 = pneg %p2241_p2 }
 0x6bd   : > { %p2247_p10 = pnand %p2246_p8, %p2242_p0 }
 0x6bf   : > { %2250 = shalt.err (!%p2247_p10)
}
 0x6c0   : > { %s2357_s11 = smov 128   ;;  %s2950_s5 = sld [smem:[#allocation37_spill]] }
 0x6c1   : > { %1857 = dma.vmem_to_hbm [thread:$0]  (%p2949_p12), %s2804_s27, 512, %s2802_s22, %s1423_s14, %s2357_s11, %s2357_s11, %s2353_s26  }
 0x6c2   : > { %s2951_s10 = sld [smem:[#allocation38_spill]]  ;;  %s1712_s24 = sshll.u32 %s2455_s19, 7 }
 0x6c3   : > { %s638_s7 = scalar_lea.vmem [#allocation17], %s2660_s17  ;;  %s2952_s22 = sld [smem:[#allocation39_spill]] }
 0x6c4   : > { %s1436_s28 = sshll.u32 %s638_s7, 4  ;;  %s1418_s23 = scalar_lea.sflag [#allocation4], %s2657_s29  ;;  %s1437_s28 = int_to_ptr.vmem [resolvable:$true] %s1436_s28 }
 0x6c5   : > { %s2251_s3 = scalar_lea.vmem %s1437_s28, 128  ;;  %s2358_s21 = smov [#allocation17]  }
 0x6c6   : > { %v1708_v23 = vld [vmem:[%s2950_s5] ss:$0 sm:$0xff]  ;;  %p2252_p4 = scmp.ne.s32.totalorder %s1437_s28, %s2251_s3  ;;  %s2255_s11 = sshll.u32 %s2358_s21, 4  ;;  %s2256_s11 = int_to_ptr.vmem [resolvable:$false] %s2255_s11 }
 0x6c7   : > { %s2257_s19 = scalar_lea.vmem %s2256_s11, 256  ;;  %p2258_p5 = scmp.lt.s32.totalorder %s1437_s28, %s2256_s11 }
 0x6c8   : > { %v1709_v25 = vld [vmem:[%s2951_s10] ss:$0 sm:$0xff]  ;;  %p2253_p3 = pnand %p2252_p4, %p2949_p12  ;;  %p2259_p9 = scmp.lt.s32.totalorder %s2257_s19, %s2251_s3 }
 0x6c9   : > { %s1434_s14 = scalar_lea.hbm %s2952_s22, %s1712_s24 }
 0x6ca   : > { %p2254_p1 = pneg %p2253_p3  ;;  %p2260_p11 = por %p2259_p9, %p2258_p5 }
 0x6cc   : > { %p2261_p13 = pnand %p2260_p11, %p2254_p1 }
 0x73d   : > { %v1395_v6 = vpop.xlane.xlu1 %1394 }
 0x73e   : > { %v1396_v20 = vmul.f32 0.03125, %v1395_v6 }
 0x740   : > { %v1397_v21 = vadd.f32 1e-05, %v1396_v20 }
 0x742   : > { %1983 = vrsqrt.f32 %v1397_v21 }
 0x74f   : > { %v1984_v22 = vpop.eup %1983 }
 0x750   : > { %v1399_v24 = vmul.f32 %v1984_v22, %v1391_v17 }
 0x752   : > { %v1407_v26 = vmul.f32 %v1708_v23, %v1399_v24 }
 0x754   : > { %v1415_v27 = vadd.f32 %v1709_v25, %v1407_v26 }
 0x756   : > { %1416 = vst.msk [vmem:[%s638_s7] sm:$0xff] %vm676_vm1, %v1415_v27 }
 0x757   : > { %2264 = shalt.err (!%p2261_p13)
}
 0x758   : > { %s2265_s17 = scalar_lea.hbm %s1434_s14, 128  ;;  %s2269_s16 = scalar_lea.hbm %s2952_s22, 256 }
 0x759   : > { %p2266_p2 = scmp.ne.s32.totalorder %s1434_s14, %s2265_s17  ;;  %p2270_p7 = scmp.lt.s32.totalorder %s1434_s14, %s2952_s22 }
 0x75a   : > { %p2271_p8 = scmp.lt.s32.totalorder %s2269_s16, %s2265_s17 }
 0x75b   : > { %p2267_p0 = pnand %p2266_p2, %p2949_p12 }
 0x75c   : > { %p2272_p10 = por %p2271_p8, %p2270_p7 }
 0x75d   : > { %p2268_p6 = pneg %p2267_p0 }
 0x75f   : > { %p2273_p4 = pnand %p2272_p10, %p2268_p6 }
 0x761   : > { %2276 = shalt.err (!%p2273_p4)
}
 0x762   : > { %1856 = dma.vmem_to_hbm [thread:$0]  (%p2949_p12), %s1437_s28, 128, %s1434_s14, %s1418_s23  }
 0x763 PF: > { %s2953_s13 = sld [smem:[#allocation27_spill]] }
 0x764   : > { %s2954_s10 = sld [smem:[#allocation32_spill]] }
 0x765   : > { %s2955_s24 = sld [smem:[#allocation28_spill]] }
 0x769   : > { %s1464_s7 = sand.u32 1, %s2953_s13  }
 0x76a   : > { %p2956_p3 = scmp.ne.s32.totalorder %s2954_s10, 0  ;;  %s1465_s26 = scalar_lea.sflag [#allocation4], %s1464_s7 }
 0x76b   : > { %p2957_p1 = scmp.ge.s32.totalorder %s2955_s24, 2 }
 0x76d   : > { %p1890_p5 = pnand %p2957_p1, %p2956_p3 }
 0x76f   : > { %p1891_p9 = pneg %p1890_p5 }
 0x771   : > { %2314 = dma.done.wait (%p1891_p9), %s1465_s26, 128  }
 0x772   : > { %2316 = vsyncadd (%p1891_p9), %s1465_s26, 4294967168  ;;  %s1474_s27 = scalar_lea.sflag [#allocation19], %s1464_s7 }
 0x773   : > { %2318 = dma.done.wait (%p1891_p9), %s1474_s27, 512  }
 0x774   : > { %2320 = vsyncadd (%p1891_p9), %s1474_s27, 4294966784  ;;  %s2958_s16 = sld [smem:[#allocation29_spill]]  ;;  %s2960_s29 = smov %s2327_s30 }
 0x775   : > { %s2959_s20 = sld [smem:[#allocation30_spill]]  ;;  %s2961_s30 = smov %s2331_s15 }
 0x77a   : > { %p37_p12 = scmp.ge.s32.totalorder %s2958_s16, 4  }
 0x77b   : > { %s2962_s15 = smov %s2959_s20 }
 0x77c   :  { %39 = sbr.rel (!%p37_p12) target bundleno = 21 (0x15), region = 185 }
 0x781   :  { %1479 = vsyncpa [#allocation3], 1 }
 0x782   :  { %1481 = vsyncpa [#allocation3 + $0x1], 1 }
 0x783   :  { %1482 = vsyncpa [#allocation6], 1 }
 0x784   :  { %1484 = vsyncpa [#allocation6 + $0x1], 1 }
 0x785   :  { %1485 = vsyncpa [#allocation9], 1 }
 0x786   :  { %1486 = vsyncpa [#allocation12], 1 }
 0x787   :  { %1487 = vsyncpa [#allocation15], 1 }
 0x788   :  { %1488 = vsyncpa [#allocation4], 1 }
 0x789   :  { %1490 = vsyncpa [#allocation4 + $0x1], 1 }
 0x78a   :  { %1491 = vsyncpa [#allocation19], 1 }
 0x78b   :  { %1493 = vsyncpa [#allocation19 + $0x1], 1 }

</bundles_post_ra>
